<compile_context>
chip_gen: v7x
topology: tpu7x:2x2x1
jax: 0.10.0
libtpu: 0.0.40
codegen_flags: <defaults>
</compile_context>

<pallas_src>
from functools import partial

import jax
import jax.numpy as jnp
from jax import lax
from jax.experimental import pallas as pl
from jax.experimental.pallas import tpu as pltpu

# ---------------- config (mirrors self.__dict__.update(config)) ----------------
N_LM  = 4            # n_lm
LR    = 0.1          # lr
BETA1 = 0.9          # beta1
BETA2 = 0.999        # beta2
EPS   = 8.0 / 255.0  # eps  (purify clamps to L2 ball of radius 2*eps)
T_MIN = 0.1          # t_min
T_MAX = 1.0          # t_max


# ------------------------- fused purify + classify kernel ----------------------
def _fused_kernel(x_ref, nt_ref, a_ref, ats_ref, g_ref, wc_ref, bc_ref,
                  out_ref, xp_ref, *, n_lm, lr, beta1, beta2, radius,
                  b_sz, c_sz):
    # x = (x - 0.5) * 2 ; ori_x = x.clone()
    x0 = (x_ref[...] - 0.5) * 2.0              # (R, HW), row r = c*B + b
    A = a_ref[...]                             # (R, R)  kron(W_d - I, I_B)
    ATs = ats_ref[...]                         # (R, R)  (2/N) * A^T
    G = g_ref[...]                             # (R, R)  per-sample group-sum

    x = x0
    m = jnp.zeros_like(x0)
    v = jnp.zeros_like(x0)

    # N_LM is small & static: unroll so the scheduler sees the whole loop and
    # the Adam bias-correction factors become compile-time constants.
    for T in range(n_lm):
        c1 = 1.0 / (1.0 - beta1 ** (T + 1))
        c2 = 1.0 / (1.0 - beta2 ** (T + 1))

        # residual of the linear diffusion step:
        #   r = W_d (x + t*eps) + b_d - x = (W_d - I) x + [W_d (t*eps) + b_d]
        r = jnp.dot(A, x, preferred_element_type=jnp.float32) + nt_ref[T]
        # analytic grad of the whole-batch MSE wrt x: (2/N) * (W_d - I)^T r
        g = jnp.dot(ATs, r, preferred_element_type=jnp.float32)

        # update_step: corrected moments carried forward (matches reference code)
        m = (beta1 * m + (1.0 - beta1) * g) * c1
        v = (beta2 * v + (1.0 - beta2) * g * g) * c2
        x = x - (lr * m) * pl.reciprocal(jnp.sqrt(v) + 1e-8, approx=True)

        # clamp(x, ori_x, eps=2*eps, p=2): per-sample L2-ball projection
        delta = x - x0
        samp = jnp.dot(G, delta * delta, preferred_element_type=jnp.float32)
        ss = jnp.sum(samp, axis=-1, keepdims=True)        # (R,1) per-sample ||d||^2
        scale = jnp.minimum(1.0, radius * lax.rsqrt(ss + 1e-24))
        x = x0 + delta * scale

    # x = clamp(x/2 + 0.5, 0, 1)  -> purified image kept in VMEM scratch
    xp_ref[...] = jnp.clip(x * 0.5 + 0.5, 0.0, 1.0)

    # fused classifier: logits = flatten(x_purified) @ W_c + b_c
    # rows c*B..c*B+B-1 of xp hold channel c of every sample -> sum C matmuls.
    acc = jnp.zeros(out_ref.shape, jnp.float32)
    for c in range(c_sz):
        acc = acc + jnp.dot(xp_ref[c * b_sz:(c + 1) * b_sz, :], wc_ref[c],
                            preferred_element_type=jnp.float32)
    out_ref[...] = acc + bc_ref[...]


# --------------------------------- forward ------------------------------------
@jax.jit
def forward(x, t, eps_noise, w_d, b_d, w_c, b_c):
    B, C, H, W = x.shape
    HW = H * W
    R = C * B
    NC = w_c.shape[1]
    NCP = ((NC + 127) // 128) * 128            # lane-dense logits, sliced below
    f32 = jnp.float32

    # channel-major row layout: row r = c*B + b  ->  x[b, c, :]
    x_rows = x.astype(f32).reshape(B, C, HW).transpose(1, 0, 2).reshape(R, HW)

    # Precompute the x-independent diffusion noise term W_d @ (t*eps) + b_d per
    # LM step (cheap XLA ops outside the iterative loop).
    teps = t.astype(f32)[:, :, None, None] * eps_noise.astype(f32).reshape(B, N_LM, C, HW)
    nterm = jnp.einsum("ij,btjl->btil", w_d.astype(f32), teps) + b_d.astype(f32)[None, None]
    nterm_rows = nterm.transpose(1, 2, 0, 3).reshape(N_LM, R, HW)   # (N_LM, R, HW)

    eye_b = jnp.eye(B, dtype=f32)
    A = jnp.kron(w_d.astype(f32) - jnp.eye(C, dtype=f32), eye_b)    # (R, R)
    ATs = (2.0 / float(B * C * H * W)) * A.T                        # grad scale folded in
    G = jnp.kron(jnp.ones((C, C), f32), eye_b)                      # same-sample row sum

    wc_p = jnp.pad(w_c.astype(f32), ((0, 0), (0, NCP - NC))).reshape(C, HW, NCP)
    bc_p = jnp.pad(b_c.astype(f32).reshape(1, -1), ((0, 0), (0, NCP - NC)))

    kernel = partial(_fused_kernel, n_lm=N_LM, lr=LR, beta1=BETA1, beta2=BETA2,
                     radius=2.0 * EPS, b_sz=B, c_sz=C)

    vmem = pltpu.MemorySpace.VMEM
    logits_p = pl.pallas_call(
        kernel,
        out_shape=jax.ShapeDtypeStruct((B, NCP), f32),
        in_specs=[pl.BlockSpec(memory_space=vmem)] * 7,
        out_specs=pl.BlockSpec(memory_space=vmem),
        scratch_shapes=[pltpu.VMEM((R, HW), f32)],
    )(x_rows, nterm_rows, A, ATs, G, wc_p, bc_p)

    return logits_p[:, :NC]


if __name__ == "__main__":
    key = jax.random.PRNGKey(0)
    B, C, H, W, NC = 2, 4, 16, 16, 10
    k1, k2, k3, k4, k5, k6 = jax.random.split(key, 6)

    # input image in [0, 1], NCHW like PyTorch
    x = jax.random.uniform(k1, (B, C, H, W), jnp.float32)

    # synthetic diffusion params (pointwise channel mix, near identity)
    w_d = jnp.eye(C, dtype=jnp.float32) + 0.1 * jax.random.normal(k2, (C, C), jnp.float32)
    b_d = 0.01 * jax.random.normal(k3, (C, 1), jnp.float32)

    # synthetic classifier params (flatten + linear)
    w_c = 0.02 * jax.random.normal(k4, (C * H * W, NC), jnp.float32)
    b_c = jnp.zeros((1, NC), jnp.float32)

    # purify randomness: per-step t ~ U[t_min, t_max] (per sample), eps ~ N(0,1)
    # TODO(synk): torch.rand/randn under set_seed cannot be bit-reproduced in JAX;
    # generated with jax.random instead.
    t = T_MIN + (T_MAX - T_MIN) * jax.random.uniform(k5, (B, N_LM), jnp.float32)
    eps_noise = jax.random.normal(k6, (B, N_LM, C, H, W), jnp.float32)

    logits = forward(x, t, eps_noise, w_d, b_d, w_c, b_c)
    jax.block_until_ready(logits)
    assert logits.shape == (B, NC) and logits.dtype == jnp.float32
    print("KERNEL_OK")
</pallas_src>

<mosaic_0001>
module attributes {stable_mosaic.version = 11 : i64} {
  func.func @_fused_kernel(%arg0: memref<8x256xf32, #tpu.memory_space<vmem>>, %arg1: memref<4x8x256xf32, #tpu.memory_space<vmem>>, %arg2: memref<8x8xf32, #tpu.memory_space<vmem>>, %arg3: memref<8x8xf32, #tpu.memory_space<vmem>>, %arg4: memref<8x8xf32, #tpu.memory_space<vmem>>, %arg5: memref<4x256x128xf32, #tpu.memory_space<vmem>>, %arg6: memref<1x128xf32, #tpu.memory_space<vmem>>, %arg7: memref<2x128xf32, #tpu.memory_space<vmem>>, %arg8: memref<8x256xf32, #tpu.memory_space<vmem>>) attributes {dimension_semantics = [], scalar_prefetch = 0 : i64, scratch_operands = 1 : i64, tpu.core_type = #tpu.core_type<tc>} {
    %c0 = arith.constant 0 : index
    %c0_0 = arith.constant 0 : index
    %0 = vector.load %arg0[%c0, %c0_0] : memref<8x256xf32, #tpu.memory_space<vmem>>, vector<8x256xf32>
    %cst = arith.constant 5.000000e-01 : f32
    %1 = vector.broadcast %cst : f32 to vector<8x256xf32>
    %2 = arith.subf %0, %1 : vector<8x256xf32>
    %cst_1 = arith.constant 2.000000e+00 : f32
    %3 = vector.broadcast %cst_1 : f32 to vector<8x256xf32>
    %4 = arith.mulf %2, %3 : vector<8x256xf32>
    %c0_2 = arith.constant 0 : index
    %c0_3 = arith.constant 0 : index
    %5 = vector.load %arg2[%c0_2, %c0_3] : memref<8x8xf32, #tpu.memory_space<vmem>>, vector<8x8xf32>
    %c0_4 = arith.constant 0 : index
    %c0_5 = arith.constant 0 : index
    %6 = vector.load %arg3[%c0_4, %c0_5] : memref<8x8xf32, #tpu.memory_space<vmem>>, vector<8x8xf32>
    %c0_6 = arith.constant 0 : index
    %c0_7 = arith.constant 0 : index
    %7 = vector.load %arg4[%c0_6, %c0_7] : memref<8x8xf32, #tpu.memory_space<vmem>>, vector<8x8xf32>
    %cst_8 = arith.constant 0.000000e+00 : f32
    %8 = vector.broadcast %cst_8 : f32 to vector<8x256xf32>
    %cst_9 = arith.constant 0.000000e+00 : f32
    %9 = vector.broadcast %cst_9 : f32 to vector<8x256xf32>
    %cst_10 = arith.constant dense<0.000000e+00> : vector<8x256xf32>
    %10 = tpu.matmul %5, %4, %cst_10 {dimension_numbers = #tpu.dot_dimension_numbers<[1], [0], [0], [1], [0, 0, 1, 1], [], []>} : vector<8x8xf32>, vector<8x256xf32>, vector<8x256xf32> -> vector<8x256xf32>
    %c0_11 = arith.constant 0 : index
    %c0_12 = arith.constant 0 : index
    %c0_13 = arith.constant 0 : index
    %11 = vector.load %arg1[%c0_11, %c0_12, %c0_13] : memref<4x8x256xf32, #tpu.memory_space<vmem>>, vector<1x8x256xf32>
    %12 = vector.shape_cast %11 : vector<1x8x256xf32> to vector<8x256xf32>
    %13 = arith.addf %10, %12 : vector<8x256xf32>
    %cst_14 = arith.constant dense<0.000000e+00> : vector<8x256xf32>
    %14 = tpu.matmul %6, %13, %cst_14 {dimension_numbers = #tpu.dot_dimension_numbers<[1], [0], [0], [1], [0, 0, 1, 1], [], []>} : vector<8x8xf32>, vector<8x256xf32>, vector<8x256xf32> -> vector<8x256xf32>
    %cst_15 = arith.constant 0.899999976 : f32
    %15 = vector.broadcast %cst_15 : f32 to vector<8x256xf32>
    %16 = arith.mulf %15, %8 : vector<8x256xf32>
    %cst_16 = arith.constant 1.000000e-01 : f32
    %17 = vector.broadcast %cst_16 : f32 to vector<8x256xf32>
    %18 = arith.mulf %17, %14 : vector<8x256xf32>
    %19 = arith.addf %16, %18 : vector<8x256xf32>
    %cst_17 = arith.constant 1.000000e+01 : f32
    %20 = vector.broadcast %cst_17 : f32 to vector<8x256xf32>
    %21 = arith.mulf %19, %20 : vector<8x256xf32>
    %cst_18 = arith.constant 9.990000e-01 : f32
    %22 = vector.broadcast %cst_18 : f32 to vector<8x256xf32>
    %23 = arith.mulf %22, %9 : vector<8x256xf32>
    %cst_19 = arith.constant 1.000000e-03 : f32
    %24 = vector.broadcast %cst_19 : f32 to vector<8x256xf32>
    %25 = arith.mulf %24, %14 : vector<8x256xf32>
    %26 = arith.mulf %25, %14 : vector<8x256xf32>
    %27 = arith.addf %23, %26 : vector<8x256xf32>
    %cst_20 = arith.constant 1.000000e+03 : f32
    %28 = vector.broadcast %cst_20 : f32 to vector<8x256xf32>
    %29 = arith.mulf %27, %28 : vector<8x256xf32>
    %cst_21 = arith.constant 1.000000e-01 : f32
    %30 = vector.broadcast %cst_21 : f32 to vector<8x256xf32>
    %31 = arith.mulf %30, %21 : vector<8x256xf32>
    %32 = math.sqrt %29 : vector<8x256xf32>
    %cst_22 = arith.constant 9.99999993E-9 : f32
    %33 = vector.broadcast %cst_22 : f32 to vector<8x256xf32>
    %34 = arith.addf %32, %33 : vector<8x256xf32>
    %35 = tpu.reciprocal %34 {approx = true} : vector<8x256xf32> -> vector<8x256xf32>
    %36 = arith.mulf %31, %35 : vector<8x256xf32>
    %37 = arith.subf %4, %36 : vector<8x256xf32>
    %38 = arith.subf %37, %4 : vector<8x256xf32>
    %39 = arith.mulf %38, %38 : vector<8x256xf32>
    %cst_23 = arith.constant dense<0.000000e+00> : vector<8x256xf32>
    %40 = tpu.matmul %7, %39, %cst_23 {dimension_numbers = #tpu.dot_dimension_numbers<[1], [0], [0], [1], [0, 0, 1, 1], [], []>} : vector<8x8xf32>, vector<8x256xf32>, vector<8x256xf32> -> vector<8x256xf32>
    %cst_24 = arith.constant dense<0.000000e+00> : vector<8xf32>
    %41 = vector.multi_reduction <add>, %40, %cst_24 [1] : vector<8x256xf32> to vector<8xf32>
    %42 = vector.shape_cast %41 : vector<8xf32> to vector<8x1xf32>
    %cst_25 = arith.constant 1.000000e-24 : f32
    %43 = vector.broadcast %cst_25 : f32 to vector<8x1xf32>
    %44 = arith.addf %42, %43 : vector<8x1xf32>
    %45 = math.rsqrt %44 : vector<8x1xf32>
    %cst_26 = arith.constant 6.274510e-02 : f32
    %46 = vector.broadcast %cst_26 : f32 to vector<8x1xf32>
    %47 = arith.mulf %46, %45 : vector<8x1xf32>
    %cst_27 = arith.constant 1.000000e+00 : f32
    %48 = vector.broadcast %cst_27 : f32 to vector<8x1xf32>
    %49 = arith.minimumf %48, %47 : vector<8x1xf32>
    %50 = vector.broadcast %49 : vector<8x1xf32> to vector<8x256xf32>
    %51 = arith.mulf %38, %50 : vector<8x256xf32>
    %52 = arith.addf %4, %51 : vector<8x256xf32>
    %cst_28 = arith.constant dense<0.000000e+00> : vector<8x256xf32>
    %53 = tpu.matmul %5, %52, %cst_28 {dimension_numbers = #tpu.dot_dimension_numbers<[1], [0], [0], [1], [0, 0, 1, 1], [], []>} : vector<8x8xf32>, vector<8x256xf32>, vector<8x256xf32> -> vector<8x256xf32>
    %c1 = arith.constant 1 : index
    %c0_29 = arith.constant 0 : index
    %c0_30 = arith.constant 0 : index
    %54 = vector.load %arg1[%c1, %c0_29, %c0_30] : memref<4x8x256xf32, #tpu.memory_space<vmem>>, vector<1x8x256xf32>
    %55 = vector.shape_cast %54 : vector<1x8x256xf32> to vector<8x256xf32>
    %56 = arith.addf %53, %55 : vector<8x256xf32>
    %cst_31 = arith.constant dense<0.000000e+00> : vector<8x256xf32>
    %57 = tpu.matmul %6, %56, %cst_31 {dimension_numbers = #tpu.dot_dimension_numbers<[1], [0], [0], [1], [0, 0, 1, 1], [], []>} : vector<8x8xf32>, vector<8x256xf32>, vector<8x256xf32> -> vector<8x256xf32>
    %cst_32 = arith.constant 0.899999976 : f32
    %58 = vector.broadcast %cst_32 : f32 to vector<8x256xf32>
    %59 = arith.mulf %58, %21 : vector<8x256xf32>
    %cst_33 = arith.constant 1.000000e-01 : f32
    %60 = vector.broadcast %cst_33 : f32 to vector<8x256xf32>
    %61 = arith.mulf %60, %57 : vector<8x256xf32>
    %62 = arith.addf %59, %61 : vector<8x256xf32>
    %cst_34 = arith.constant 5.26315784 : f32
    %63 = vector.broadcast %cst_34 : f32 to vector<8x256xf32>
    %64 = arith.mulf %62, %63 : vector<8x256xf32>
    %cst_35 = arith.constant 9.990000e-01 : f32
    %65 = vector.broadcast %cst_35 : f32 to vector<8x256xf32>
    %66 = arith.mulf %65, %29 : vector<8x256xf32>
    %cst_36 = arith.constant 1.000000e-03 : f32
    %67 = vector.broadcast %cst_36 : f32 to vector<8x256xf32>
    %68 = arith.mulf %67, %57 : vector<8x256xf32>
    %69 = arith.mulf %68, %57 : vector<8x256xf32>
    %70 = arith.addf %66, %69 : vector<8x256xf32>
    %cst_37 = arith.constant 500.250122 : f32
    %71 = vector.broadcast %cst_37 : f32 to vector<8x256xf32>
    %72 = arith.mulf %70, %71 : vector<8x256xf32>
    %cst_38 = arith.constant 1.000000e-01 : f32
    %73 = vector.broadcast %cst_38 : f32 to vector<8x256xf32>
    %74 = arith.mulf %73, %64 : vector<8x256xf32>
    %75 = math.sqrt %72 : vector<8x256xf32>
    %cst_39 = arith.constant 9.99999993E-9 : f32
    %76 = vector.broadcast %cst_39 : f32 to vector<8x256xf32>
    %77 = arith.addf %75, %76 : vector<8x256xf32>
    %78 = tpu.reciprocal %77 {approx = true} : vector<8x256xf32> -> vector<8x256xf32>
    %79 = arith.mulf %74, %78 : vector<8x256xf32>
    %80 = arith.subf %52, %79 : vector<8x256xf32>
    %81 = arith.subf %80, %4 : vector<8x256xf32>
    %82 = arith.mulf %81, %81 : vector<8x256xf32>
    %cst_40 = arith.constant dense<0.000000e+00> : vector<8x256xf32>
    %83 = tpu.matmul %7, %82, %cst_40 {dimension_numbers = #tpu.dot_dimension_numbers<[1], [0], [0], [1], [0, 0, 1, 1], [], []>} : vector<8x8xf32>, vector<8x256xf32>, vector<8x256xf32> -> vector<8x256xf32>
    %cst_41 = arith.constant dense<0.000000e+00> : vector<8xf32>
    %84 = vector.multi_reduction <add>, %83, %cst_41 [1] : vector<8x256xf32> to vector<8xf32>
    %85 = vector.shape_cast %84 : vector<8xf32> to vector<8x1xf32>
    %cst_42 = arith.constant 1.000000e-24 : f32
    %86 = vector.broadcast %cst_42 : f32 to vector<8x1xf32>
    %87 = arith.addf %85, %86 : vector<8x1xf32>
    %88 = math.rsqrt %87 : vector<8x1xf32>
    %cst_43 = arith.constant 6.274510e-02 : f32
    %89 = vector.broadcast %cst_43 : f32 to vector<8x1xf32>
    %90 = arith.mulf %89, %88 : vector<8x1xf32>
    %cst_44 = arith.constant 1.000000e+00 : f32
    %91 = vector.broadcast %cst_44 : f32 to vector<8x1xf32>
    %92 = arith.minimumf %91, %90 : vector<8x1xf32>
    %93 = vector.broadcast %92 : vector<8x1xf32> to vector<8x256xf32>
    %94 = arith.mulf %81, %93 : vector<8x256xf32>
    %95 = arith.addf %4, %94 : vector<8x256xf32>
    %cst_45 = arith.constant dense<0.000000e+00> : vector<8x256xf32>
    %96 = tpu.matmul %5, %95, %cst_45 {dimension_numbers = #tpu.dot_dimension_numbers<[1], [0], [0], [1], [0, 0, 1, 1], [], []>} : vector<8x8xf32>, vector<8x256xf32>, vector<8x256xf32> -> vector<8x256xf32>
    %c2 = arith.constant 2 : index
    %c0_46 = arith.constant 0 : index
    %c0_47 = arith.constant 0 : index
    %97 = vector.load %arg1[%c2, %c0_46, %c0_47] : memref<4x8x256xf32, #tpu.memory_space<vmem>>, vector<1x8x256xf32>
    %98 = vector.shape_cast %97 : vector<1x8x256xf32> to vector<8x256xf32>
    %99 = arith.addf %96, %98 : vector<8x256xf32>
    %cst_48 = arith.constant dense<0.000000e+00> : vector<8x256xf32>
    %100 = tpu.matmul %6, %99, %cst_48 {dimension_numbers = #tpu.dot_dimension_numbers<[1], [0], [0], [1], [0, 0, 1, 1], [], []>} : vector<8x8xf32>, vector<8x256xf32>, vector<8x256xf32> -> vector<8x256xf32>
    %cst_49 = arith.constant 0.899999976 : f32
    %101 = vector.broadcast %cst_49 : f32 to vector<8x256xf32>
    %102 = arith.mulf %101, %64 : vector<8x256xf32>
    %cst_50 = arith.constant 1.000000e-01 : f32
    %103 = vector.broadcast %cst_50 : f32 to vector<8x256xf32>
    %104 = arith.mulf %103, %100 : vector<8x256xf32>
    %105 = arith.addf %102, %104 : vector<8x256xf32>
    %cst_51 = arith.constant 3.69003701 : f32
    %106 = vector.broadcast %cst_51 : f32 to vector<8x256xf32>
    %107 = arith.mulf %105, %106 : vector<8x256xf32>
    %cst_52 = arith.constant 9.990000e-01 : f32
    %108 = vector.broadcast %cst_52 : f32 to vector<8x256xf32>
    %109 = arith.mulf %108, %72 : vector<8x256xf32>
    %cst_53 = arith.constant 1.000000e-03 : f32
    %110 = vector.broadcast %cst_53 : f32 to vector<8x256xf32>
    %111 = arith.mulf %110, %100 : vector<8x256xf32>
    %112 = arith.mulf %111, %100 : vector<8x256xf32>
    %113 = arith.addf %109, %112 : vector<8x256xf32>
    %cst_54 = arith.constant 333.666901 : f32
    %114 = vector.broadcast %cst_54 : f32 to vector<8x256xf32>
    %115 = arith.mulf %113, %114 : vector<8x256xf32>
    %cst_55 = arith.constant 1.000000e-01 : f32
    %116 = vector.broadcast %cst_55 : f32 to vector<8x256xf32>
    %117 = arith.mulf %116, %107 : vector<8x256xf32>
    %118 = math.sqrt %115 : vector<8x256xf32>
    %cst_56 = arith.constant 9.99999993E-9 : f32
    %119 = vector.broadcast %cst_56 : f32 to vector<8x256xf32>
    %120 = arith.addf %118, %119 : vector<8x256xf32>
    %121 = tpu.reciprocal %120 {approx = true} : vector<8x256xf32> -> vector<8x256xf32>
    %122 = arith.mulf %117, %121 : vector<8x256xf32>
    %123 = arith.subf %95, %122 : vector<8x256xf32>
    %124 = arith.subf %123, %4 : vector<8x256xf32>
    %125 = arith.mulf %124, %124 : vector<8x256xf32>
    %cst_57 = arith.constant dense<0.000000e+00> : vector<8x256xf32>
    %126 = tpu.matmul %7, %125, %cst_57 {dimension_numbers = #tpu.dot_dimension_numbers<[1], [0], [0], [1], [0, 0, 1, 1], [], []>} : vector<8x8xf32>, vector<8x256xf32>, vector<8x256xf32> -> vector<8x256xf32>
    %cst_58 = arith.constant dense<0.000000e+00> : vector<8xf32>
    %127 = vector.multi_reduction <add>, %126, %cst_58 [1] : vector<8x256xf32> to vector<8xf32>
    %128 = vector.shape_cast %127 : vector<8xf32> to vector<8x1xf32>
    %cst_59 = arith.constant 1.000000e-24 : f32
    %129 = vector.broadcast %cst_59 : f32 to vector<8x1xf32>
    %130 = arith.addf %128, %129 : vector<8x1xf32>
    %131 = math.rsqrt %130 : vector<8x1xf32>
    %cst_60 = arith.constant 6.274510e-02 : f32
    %132 = vector.broadcast %cst_60 : f32 to vector<8x1xf32>
    %133 = arith.mulf %132, %131 : vector<8x1xf32>
    %cst_61 = arith.constant 1.000000e+00 : f32
    %134 = vector.broadcast %cst_61 : f32 to vector<8x1xf32>
    %135 = arith.minimumf %134, %133 : vector<8x1xf32>
    %136 = vector.broadcast %135 : vector<8x1xf32> to vector<8x256xf32>
    %137 = arith.mulf %124, %136 : vector<8x256xf32>
    %138 = arith.addf %4, %137 : vector<8x256xf32>
    %cst_62 = arith.constant dense<0.000000e+00> : vector<8x256xf32>
    %139 = tpu.matmul %5, %138, %cst_62 {dimension_numbers = #tpu.dot_dimension_numbers<[1], [0], [0], [1], [0, 0, 1, 1], [], []>} : vector<8x8xf32>, vector<8x256xf32>, vector<8x256xf32> -> vector<8x256xf32>
    %c3 = arith.constant 3 : index
    %c0_63 = arith.constant 0 : index
    %c0_64 = arith.constant 0 : index
    %140 = vector.load %arg1[%c3, %c0_63, %c0_64] : memref<4x8x256xf32, #tpu.memory_space<vmem>>, vector<1x8x256xf32>
    %141 = vector.shape_cast %140 : vector<1x8x256xf32> to vector<8x256xf32>
    %142 = arith.addf %139, %141 : vector<8x256xf32>
    %cst_65 = arith.constant dense<0.000000e+00> : vector<8x256xf32>
    %143 = tpu.matmul %6, %142, %cst_65 {dimension_numbers = #tpu.dot_dimension_numbers<[1], [0], [0], [1], [0, 0, 1, 1], [], []>} : vector<8x8xf32>, vector<8x256xf32>, vector<8x256xf32> -> vector<8x256xf32>
    %cst_66 = arith.constant 0.899999976 : f32
    %144 = vector.broadcast %cst_66 : f32 to vector<8x256xf32>
    %145 = arith.mulf %144, %107 : vector<8x256xf32>
    %cst_67 = arith.constant 1.000000e-01 : f32
    %146 = vector.broadcast %cst_67 : f32 to vector<8x256xf32>
    %147 = arith.mulf %146, %143 : vector<8x256xf32>
    %148 = arith.addf %145, %147 : vector<8x256xf32>
    %cst_68 = arith.constant 2.90782213 : f32
    %149 = vector.broadcast %cst_68 : f32 to vector<8x256xf32>
    %150 = arith.mulf %148, %149 : vector<8x256xf32>
    %cst_69 = arith.constant 9.990000e-01 : f32
    %151 = vector.broadcast %cst_69 : f32 to vector<8x256xf32>
    %152 = arith.mulf %151, %115 : vector<8x256xf32>
    %cst_70 = arith.constant 1.000000e-03 : f32
    %153 = vector.broadcast %cst_70 : f32 to vector<8x256xf32>
    %154 = arith.mulf %153, %143 : vector<8x256xf32>
    %155 = arith.mulf %154, %143 : vector<8x256xf32>
    %156 = arith.addf %152, %155 : vector<8x256xf32>
    %cst_71 = arith.constant 250.375305 : f32
    %157 = vector.broadcast %cst_71 : f32 to vector<8x256xf32>
    %158 = arith.mulf %156, %157 : vector<8x256xf32>
    %cst_72 = arith.constant 1.000000e-01 : f32
    %159 = vector.broadcast %cst_72 : f32 to vector<8x256xf32>
    %160 = arith.mulf %159, %150 : vector<8x256xf32>
    %161 = math.sqrt %158 : vector<8x256xf32>
    %cst_73 = arith.constant 9.99999993E-9 : f32
    %162 = vector.broadcast %cst_73 : f32 to vector<8x256xf32>
    %163 = arith.addf %161, %162 : vector<8x256xf32>
    %164 = tpu.reciprocal %163 {approx = true} : vector<8x256xf32> -> vector<8x256xf32>
    %165 = arith.mulf %160, %164 : vector<8x256xf32>
    %166 = arith.subf %138, %165 : vector<8x256xf32>
    %167 = arith.subf %166, %4 : vector<8x256xf32>
    %168 = arith.mulf %167, %167 : vector<8x256xf32>
    %cst_74 = arith.constant dense<0.000000e+00> : vector<8x256xf32>
    %169 = tpu.matmul %7, %168, %cst_74 {dimension_numbers = #tpu.dot_dimension_numbers<[1], [0], [0], [1], [0, 0, 1, 1], [], []>} : vector<8x8xf32>, vector<8x256xf32>, vector<8x256xf32> -> vector<8x256xf32>
    %cst_75 = arith.constant dense<0.000000e+00> : vector<8xf32>
    %170 = vector.multi_reduction <add>, %169, %cst_75 [1] : vector<8x256xf32> to vector<8xf32>
    %171 = vector.shape_cast %170 : vector<8xf32> to vector<8x1xf32>
    %cst_76 = arith.constant 1.000000e-24 : f32
    %172 = vector.broadcast %cst_76 : f32 to vector<8x1xf32>
    %173 = arith.addf %171, %172 : vector<8x1xf32>
    %174 = math.rsqrt %173 : vector<8x1xf32>
    %cst_77 = arith.constant 6.274510e-02 : f32
    %175 = vector.broadcast %cst_77 : f32 to vector<8x1xf32>
    %176 = arith.mulf %175, %174 : vector<8x1xf32>
    %cst_78 = arith.constant 1.000000e+00 : f32
    %177 = vector.broadcast %cst_78 : f32 to vector<8x1xf32>
    %178 = arith.minimumf %177, %176 : vector<8x1xf32>
    %179 = vector.broadcast %178 : vector<8x1xf32> to vector<8x256xf32>
    %180 = arith.mulf %167, %179 : vector<8x256xf32>
    %181 = arith.addf %4, %180 : vector<8x256xf32>
    %cst_79 = arith.constant 5.000000e-01 : f32
    %182 = vector.broadcast %cst_79 : f32 to vector<8x256xf32>
    %183 = arith.mulf %181, %182 : vector<8x256xf32>
    %cst_80 = arith.constant 5.000000e-01 : f32
    %184 = vector.broadcast %cst_80 : f32 to vector<8x256xf32>
    %185 = arith.addf %183, %184 : vector<8x256xf32>
    %cst_81 = arith.constant 0.000000e+00 : f32
    %cst_82 = arith.constant 1.000000e+00 : f32
    %186 = vector.broadcast %cst_81 : f32 to vector<8x256xf32>
    %187 = arith.maximumf %186, %185 : vector<8x256xf32>
    %188 = vector.broadcast %cst_82 : f32 to vector<8x256xf32>
    %189 = arith.minimumf %188, %187 : vector<8x256xf32>
    %c0_83 = arith.constant 0 : index
    %c0_84 = arith.constant 0 : index
    %190 = vector.load %arg8[%c0_83, %c0_84] : memref<8x256xf32, #tpu.memory_space<vmem>>, vector<8x256xf32>
    tpu.vector_store %arg8[%c0_83, %c0_84], %189 {strides = array<i32>} : memref<8x256xf32, #tpu.memory_space<vmem>>, vector<8x256xf32>,
    %cst_85 = arith.constant 0.000000e+00 : f32
    %191 = vector.broadcast %cst_85 : f32 to vector<2x128xf32>
    %c0_86 = arith.constant 0 : index
    %c0_87 = arith.constant 0 : index
    %192 = vector.load %arg8[%c0_86, %c0_87] : memref<8x256xf32, #tpu.memory_space<vmem>>, vector<2x256xf32>
    %c0_88 = arith.constant 0 : index
    %c0_89 = arith.constant 0 : index
    %c0_90 = arith.constant 0 : index
    %193 = vector.load %arg5[%c0_88, %c0_89, %c0_90] : memref<4x256x128xf32, #tpu.memory_space<vmem>>, vector<1x256x128xf32>
    %194 = vector.shape_cast %193 : vector<1x256x128xf32> to vector<256x128xf32>
    %cst_91 = arith.constant dense<0.000000e+00> : vector<2x128xf32>
    %195 = tpu.matmul %192, %194, %cst_91 {dimension_numbers = #tpu.dot_dimension_numbers<[1], [0], [0], [1], [0, 0, 1, 1], [], []>} : vector<2x256xf32>, vector<256x128xf32>, vector<2x128xf32> -> vector<2x128xf32>
    %196 = arith.addf %191, %195 : vector<2x128xf32>
    %c2_92 = arith.constant 2 : index
    %c0_93 = arith.constant 0 : index
    %197 = vector.load %arg8[%c2_92, %c0_93] : memref<8x256xf32, #tpu.memory_space<vmem>>, vector<2x256xf32>
    %c1_94 = arith.constant 1 : index
    %c0_95 = arith.constant 0 : index
    %c0_96 = arith.constant 0 : index
    %198 = vector.load %arg5[%c1_94, %c0_95, %c0_96] : memref<4x256x128xf32, #tpu.memory_space<vmem>>, vector<1x256x128xf32>
    %199 = vector.shape_cast %198 : vector<1x256x128xf32> to vector<256x128xf32>
    %cst_97 = arith.constant dense<0.000000e+00> : vector<2x128xf32>
    %200 = tpu.matmul %197, %199, %cst_97 {dimension_numbers = #tpu.dot_dimension_numbers<[1], [0], [0], [1], [0, 0, 1, 1], [], []>} : vector<2x256xf32>, vector<256x128xf32>, vector<2x128xf32> -> vector<2x128xf32>
    %201 = arith.addf %196, %200 : vector<2x128xf32>
    %c4 = arith.constant 4 : index
    %c0_98 = arith.constant 0 : index
    %202 = vector.load %arg8[%c4, %c0_98] : memref<8x256xf32, #tpu.memory_space<vmem>>, vector<2x256xf32>
    %c2_99 = arith.constant 2 : index
    %c0_100 = arith.constant 0 : index
    %c0_101 = arith.constant 0 : index
    %203 = vector.load %arg5[%c2_99, %c0_100, %c0_101] : memref<4x256x128xf32, #tpu.memory_space<vmem>>, vector<1x256x128xf32>
    %204 = vector.shape_cast %203 : vector<1x256x128xf32> to vector<256x128xf32>
    %cst_102 = arith.constant dense<0.000000e+00> : vector<2x128xf32>
    %205 = tpu.matmul %202, %204, %cst_102 {dimension_numbers = #tpu.dot_dimension_numbers<[1], [0], [0], [1], [0, 0, 1, 1], [], []>} : vector<2x256xf32>, vector<256x128xf32>, vector<2x128xf32> -> vector<2x128xf32>
    %206 = arith.addf %201, %205 : vector<2x128xf32>
    %c6 = arith.constant 6 : index
    %c0_103 = arith.constant 0 : index
    %207 = vector.load %arg8[%c6, %c0_103] : memref<8x256xf32, #tpu.memory_space<vmem>>, vector<2x256xf32>
    %c3_104 = arith.constant 3 : index
    %c0_105 = arith.constant 0 : index
    %c0_106 = arith.constant 0 : index
    %208 = vector.load %arg5[%c3_104, %c0_105, %c0_106] : memref<4x256x128xf32, #tpu.memory_space<vmem>>, vector<1x256x128xf32>
    %209 = vector.shape_cast %208 : vector<1x256x128xf32> to vector<256x128xf32>
    %cst_107 = arith.constant dense<0.000000e+00> : vector<2x128xf32>
    %210 = tpu.matmul %207, %209, %cst_107 {dimension_numbers = #tpu.dot_dimension_numbers<[1], [0], [0], [1], [0, 0, 1, 1], [], []>} : vector<2x256xf32>, vector<256x128xf32>, vector<2x128xf32> -> vector<2x128xf32>
    %211 = arith.addf %206, %210 : vector<2x128xf32>
    %c0_108 = arith.constant 0 : index
    %c0_109 = arith.constant 0 : index
    %212 = vector.load %arg6[%c0_108, %c0_109] : memref<1x128xf32, #tpu.memory_space<vmem>>, vector<1x128xf32>
    %213 = vector.broadcast %212 : vector<1x128xf32> to vector<2x128xf32>
    %214 = arith.addf %211, %213 : vector<2x128xf32>
    %c0_110 = arith.constant 0 : index
    %c0_111 = arith.constant 0 : index
    %215 = vector.load %arg7[%c0_110, %c0_111] : memref<2x128xf32, #tpu.memory_space<vmem>>, vector<2x128xf32>
    tpu.vector_store %arg7[%c0_110, %c0_111], %214 {strides = array<i32>} : memref<2x128xf32, #tpu.memory_space<vmem>>, vector<2x128xf32>,
    return
  }
}

</mosaic_0001>

<bundles_post_ra>
// kernel: forward.1
= control target key start
LH: loop header
LB: loop body
LE: loop exit
PB: predicated region body
PF: predicated region fallthrough
CT: control target
= control target key end

     0   :  { %v2056_v4 = vmov 0.0   ;;  %s2690_s0 = inlined_call_operand.vmem [shape: f32[8,256], index: 0, kind: input, shape index: {}]   ;;  %s2691_s1 = inlined_call_operand.vmem [shape: f32[4,8,256], index: 1, kind: input, shape index: {}]   ;;  %s2692_s2 = inlined_call_operand.vmem [shape: f32[8,8], index: 2, kind: input, shape index: {}]   ;;  %s2693_s3 = inlined_call_operand.vmem [shape: f32[8,8], index: 3, kind: input, shape index: {}]   ;;  %s2694_s4 = inlined_call_operand.vmem [shape: f32[8,8], index: 4, kind: input, shape index: {}]   ;;  %s2695_s5 = inlined_call_operand.vmem [shape: f32[4,256,128], index: 5, kind: input, shape index: {}]   ;;  %s2696_s6 = inlined_call_operand.vmem [shape: f32[1,128], index: 6, kind: input, shape index: {}]   ;;  %s2697_s7 = inlined_call_operand.hbm [shape: f32[2,128], index: 7, kind: output, shape index: {}]  }
   0x1   :  { %v28_v0 = vld [vmem:[%s2690_s0 + $0x8] sm:$0xff]  ;;  %v27_v1 = vld [vmem:[%s2690_s0] sm:$0xff]  ;;  %106 = vmatprep.mubr.f32.mxu0 %v2056_v4  ;;  %180 = vmatprep.mubr.f32.mxu1 %v2056_v4 }
   0x2   :  { %v1606_v2 = vadd.f32 -0.5, %v28_v0  ;;  %v1605_v3 = vadd.f32 -0.5, %v27_v1 }
   0x3   :  { %12 = vsyncpa [#allocation4], 0  ;;  %v2113_v7 = vld [vmem:[%s2692_s2] sm:$0xff]  ;;  %vm38_vm0 = vcmask 64512   ;;  %v37_v8 = vld [vmem:[%s2691_s1 + $0x8] sm:$0xff]  ;;  %s2057_s27 = smov [#allocation3]  }
   0x4   :  { %v2106_v5 = vmul.f32 2.0, %v1606_v2  ;;  %v2108_v6 = vmul.f32 2.0, %v1605_v3  ;;  %v36_v9 = vld [vmem:[%s2691_s1] sm:$0xff]  ;;  %v1611_v0 = vld [vmem:[%s2691_s1 + $0x18] sm:$0xff]  ;;  %v1610_v1 = vld [vmem:[%s2691_s1 + $0x10] sm:$0xff]  ;;  %s1597_s28 = sshll.u32 %s2057_s27, 4  ;;  %s1598_s28 = int_to_ptr.vmem [resolvable:$true] %s1597_s28 }
   0x5   :  { %v2129_v14 = vld [vmem:[%s2693_s3] sm:$0xff]  ;;  %s2032_s29 = scalar_lea.vmem %s1598_s28, 32  ;;  %p2037_p1 = scmp.lt.s32.totalorder %s1598_s28, %s1598_s28 }
   0x6   :  { %42 = vmatprep.subr.mxu0 %v2106_v5  ;;  %v2157_v51 = vld [vmem:[%s2694_s4] sm:$0xff]  ;;  %p2033_p0 = scmp.ne.s32.totalorder %s1598_s28, %s2032_s29  ;;  %p2038_p2 = scmp.lt.s32.totalorder %s2032_s29, %s2032_s29 }
   0x7   :  { %43 = vmatpush1.msra.mxu0 %v2108_v6 }
   0x8   :  { %1607 = vmatmul.mubr.msk.f32.vlgmr.msra.gmra.mrb[0].mxu0 %vm38_vm0, %v2113_v7  ;;  %p2039_p3 = por %p2038_p2, %p2037_p1 }
   0x9   :  { %296 = vmatprep.mubr.f32.mxu0 %v2056_v4 }
   0xa   :  { %p2040_p4 = pnand %p2039_p3, %p2033_p0 }
  0xdb   :  { %v108_v10 = vpop.f32.mrb[0].mxu0 }
  0xdc   :  { %v110_v11 = vpop.f32.mrb[1].mxu0  ;;  %v109_v13 = vadd.f32 %v108_v10, %v36_v9 }
  0xdd   :  { %v111_v12 = vadd.f32 %v110_v11, %v37_v8 }
  0xdf   :  { %116 = vmatprep.subr.mxu1 %v111_v12 }
  0xe0   :  { %117 = vmatpush1.msra.mxu1 %v109_v13 }
  0xe1   :  { %1608 = vmatmul.mubr.msk.f32.vlgmr.msra.gmra.mrb[0].mxu1 %vm38_vm0, %v2129_v14 }
  0xe2   :  { %381 = vmatprep.mubr.f32.mxu1 %v2056_v4 }
 0x1b4   :  { %v182_v15 = vpop.f32.mrb[0].mxu1 }
 0x1b5   :  { %v193_v16 = vmul.f32 0.001, %v182_v15  ;;  %v184_v17 = vpop.f32.mrb[1].mxu1  ;;  %v187_v35 = vmul.f32 0.1, %v182_v15 }
 0x1b6   :  { %v194_v18 = vmul.f32 0.001, %v184_v17  ;;  %v188_v36 = vmul.f32 0.1, %v184_v17 }
 0x1b7   :  { %v195_v19 = vmul.f32 %v193_v16, %v182_v15  ;;  %v191_v37 = vmul.f32 10.0, %v187_v35 }
 0x1b8   :  { %v196_v20 = vmul.f32 %v194_v18, %v184_v17  ;;  %v192_v38 = vmul.f32 10.0, %v188_v36 }
 0x1b9   :  { %v2134_v21 = vmul.f32 1000.0, %v195_v19  ;;  %v201_v39 = vmul.f32 0.1, %v191_v37  ;;  %v459_v10 = vmul.f32 0.9, %v191_v37 }
 0x1ba   :  { %v2136_v22 = vmul.f32 1000.0, %v196_v20  ;;  %v202_v41 = vmul.f32 0.1, %v192_v38  ;;  %v460_v16 = vmul.f32 0.9, %v192_v38 }
 0x1bb   :  { %1992 = vrsqrt.f32 %v2134_v21  ;;  %vm205_vm1 = vcmp.eq.f32.partialorder %v2134_v21, inf  ;;  %v208_v26 = vand.u32 2147483648, %v2134_v21  ;;  %vm207_vm2 = vcmp.eq.f32.partialorder %v2134_v21, 0.0 }
 0x1bc   :  { %1994 = vrsqrt.f32 %v2136_v22  ;;  %vm212_vm3 = vcmp.eq.f32.partialorder %v2136_v22, inf  ;;  %v215_v29 = vand.u32 2147483648, %v2136_v22  ;;  %vm214_vm4 = vcmp.eq.f32.partialorder %v2136_v22, 0.0 }
 0x1bd   :  { %v467_v20 = vmul.f32 0.999, %v2134_v21 }
 0x1c5   :  { %v1993_v23 = vpop.eup %1992 }
 0x1c6   :  { %v1995_v24 = vpop.eup %1994  ;;  %v204_v25 = vmul.f32 %v1993_v23, %v2134_v21 }
 0x1c7   :  { %v211_v27 = vmul.f32 %v1995_v24, %v2136_v22 }
 0x1c8   :  { %v206_v28 = vsel %vm205_vm1, %v2134_v21, %v204_v25  ;;  %v468_v25 = vmul.f32 0.999, %v2136_v22 }
 0x1c9   :  { %v209_v30 = vsel %vm207_vm2, %v208_v26, %v206_v28  ;;  %v213_v31 = vsel %vm212_vm3, %v2136_v22, %v211_v27 }
 0x1ca   :  { %v217_v32 = vadd.f32 1e-08, %v209_v30  ;;  %v216_v33 = vsel %vm214_vm4, %v215_v29, %v213_v31 }
 0x1cb   :  { %v218_v34 = vadd.f32 1e-08, %v216_v33 }
 0x1cc   :  { %1996 = vrcp.f32 %v217_v32 }
 0x1cd   :  { %1998 = vrcp.f32 %v218_v34 }
 0x1d6   :  { %v1997_v40 = vpop.eup %1996 }
 0x1d7   :  { %v1999_v42 = vpop.eup %1998  ;;  %v221_v43 = vmul.f32 %v1997_v40, %v201_v39 }
 0x1d8   :  { %v222_v44 = vmul.f32 %v1999_v42, %v202_v41 }
 0x1d9   :  { %v223_v45 = vsub.f32 %v2108_v6, %v221_v43 }
 0x1da   :  { %v224_v46 = vsub.f32 %v2106_v5, %v222_v44 }
 0x1db   :  { %v225_v47 = vsub.f32 %v223_v45, %v2108_v6 }
 0x1dc   :  { %v226_v48 = vsub.f32 %v224_v46, %v2106_v5 }
 0x1dd   :  { %v227_v50 = vmul.f32 %v225_v47, %v225_v47 }
 0x1de   :  { %v228_v49 = vmul.f32 %v226_v48, %v226_v48 }
 0x1e0   :  { %232 = vmatprep.subr.mxu0 %v228_v49 }
 0x1e1   :  { %233 = vmatpush1.msra.mxu0 %v227_v50 }
 0x1e2   :  { %1609 = vmatmul.mubr.msk.f32.vlgmr.msra.gmra.mrb[2].mxu0 %vm38_vm0, %v2157_v51 }
 0x1e3   :  { %452 = vmatprep.mubr.f32.mxu0 %v2056_v4 }
 0x2b5   :  { %v298_v52 = vpop.f32.mrb[2].mxu0 }
 0x2b6   :  { %v300_v53 = vpop.f32.mrb[3].mxu0 }
 0x2b7   :  { %v303_v54 = vadd.f32 %v300_v53, %v298_v52 }
 0x2b9   :  { %304 = vadd.xlane.f32.xlu0 %v303_v54 }
 0x346   :  { %v305_v55 = vpop.xlane.xlu0 %304 }
 0x347   :  { %v306_v56 = vadd.f32 1e-24, %v305_v55 }
 0x349   :  { %2000 = vrsqrt.f32 %v306_v56 }
 0x353   :  { %v2001_v57 = vpop.eup %2000 }
 0x354   :  { %v308_v58 = vmul.f32 0.0627451, %v2001_v57 }
 0x356   :  { %v309_v59 = vmin.f32 %v308_v58, 1.0 }
 0x358   :  { %v310_v60 = vmul.f32 %v309_v59, %v225_v47  ;;  %v311_v61 = vmul.f32 %v309_v59, %v226_v48 }
 0x35a   :  { %v2163_v62 = vadd.f32 %v311_v61, %v2106_v5  ;;  %v2166_v63 = vadd.f32 %v310_v60, %v2108_v6 }
 0x35c   :  { %317 = vmatprep.subr.mxu1 %v2163_v62 }
 0x35d   :  { %318 = vmatpush1.msra.mxu1 %v2166_v63 }
 0x35e   :  { %1612 = vmatmul.mubr.msk.f32.vlgmr.msra.gmra.mrb[2].mxu1 %vm38_vm0, %v2113_v7 }
 0x35f   :  { %569 = vmatprep.mubr.f32.mxu1 %v2056_v4 }
 0x431   :  { %v383_v2 = vpop.f32.mrb[2].mxu1 }
 0x432   :  { %v385_v3 = vpop.f32.mrb[3].mxu1  ;;  %v384_v9 = vadd.f32 %v1610_v1, %v383_v2 }
 0x433   :  { %v386_v8 = vadd.f32 %v1611_v0, %v385_v3 }
 0x435   :  { %388 = vmatprep.subr.mxu0 %v386_v8  ;;  %v1616_v8 = vld [vmem:[%s2691_s1 + $0x28] sm:$0xff] }
 0x436   :  { %389 = vmatpush1.msra.mxu0 %v384_v9  ;;  %v1615_v9 = vld [vmem:[%s2691_s1 + $0x20] sm:$0xff] }
 0x437   :  { %1613 = vmatmul.mubr.msk.f32.vlgmr.msra.gmra.mrb[4].mxu0 %vm38_vm0, %v2129_v14 }
 0x438   :  { %654 = vmatprep.mubr.f32.mxu0 %v2056_v4 }
 0x50a   :  { %v454_v11 = vpop.f32.mrb[4].mxu0 }
 0x50b   :  { %v461_v12 = vmul.f32 0.1, %v454_v11  ;;  %v469_v13 = vmul.f32 0.001, %v454_v11  ;;  %v456_v15 = vpop.f32.mrb[5].mxu0 }
 0x50c   :  { %v462_v17 = vmul.f32 0.1, %v456_v15  ;;  %v470_v18 = vmul.f32 0.001, %v456_v15 }
 0x50d   :  { %v463_v19 = vadd.f32 %v461_v12, %v459_v10  ;;  %v471_v23 = vmul.f32 %v469_v13, %v454_v11 }
 0x50e   :  { %v464_v24 = vadd.f32 %v462_v17, %v460_v16  ;;  %v472_v26 = vmul.f32 %v470_v18, %v456_v15 }
 0x50f   :  { %v473_v27 = vadd.f32 %v471_v23, %v467_v20  ;;  %v465_v41 = vmul.f32 5.263158, %v463_v19 }
 0x510   :  { %v474_v28 = vadd.f32 %v472_v26, %v468_v25  ;;  %v466_v42 = vmul.f32 5.263158, %v464_v24 }
 0x511   :  { %v2184_v29 = vmul.f32 500.25012, %v473_v27  ;;  %v477_v43 = vmul.f32 0.1, %v465_v41  ;;  %v732_v16 = vmul.f32 0.9, %v465_v41 }
 0x512   :  { %v2186_v30 = vmul.f32 500.25012, %v474_v28  ;;  %v478_v45 = vmul.f32 0.1, %v466_v42  ;;  %v733_v20 = vmul.f32 0.9, %v466_v42 }
 0x513   :  { %2002 = vrsqrt.f32 %v2184_v29  ;;  %vm481_vm5 = vcmp.eq.f32.partialorder %v2184_v29, inf  ;;  %v484_v21 = vand.u32 2147483648, %v2184_v29  ;;  %vm483_vm6 = vcmp.eq.f32.partialorder %v2184_v29, 0.0 }
 0x514   :  { %2004 = vrsqrt.f32 %v2186_v30  ;;  %vm488_vm7 = vcmp.eq.f32.partialorder %v2186_v30, inf  ;;  %v491_v35 = vand.u32 2147483648, %v2186_v30  ;;  %vm490_vm8 = vcmp.eq.f32.partialorder %v2186_v30, 0.0 }
 0x515   :  { %v740_v26 = vmul.f32 0.999, %v2184_v29 }
 0x51d   :  { %v2003_v31 = vpop.eup %2002 }
 0x51e   :  { %v2005_v32 = vpop.eup %2004  ;;  %v480_v33 = vmul.f32 %v2003_v31, %v2184_v29  ;;  %v741_v31 = vmul.f32 0.999, %v2186_v30 }
 0x51f   :  { %v487_v22 = vmul.f32 %v2005_v32, %v2186_v30 }
 0x520   :  { %v482_v34 = vsel %vm481_vm5, %v2184_v29, %v480_v33 }
 0x521   :  { %v485_v36 = vsel %vm483_vm6, %v484_v21, %v482_v34  ;;  %v489_v37 = vsel %vm488_vm7, %v2186_v30, %v487_v22 }
 0x522   :  { %v493_v38 = vadd.f32 1e-08, %v485_v36  ;;  %v492_v39 = vsel %vm490_vm8, %v491_v35, %v489_v37 }
 0x523   :  { %v494_v40 = vadd.f32 1e-08, %v492_v39 }
 0x524   :  { %2006 = vrcp.f32 %v493_v38 }
 0x525   :  { %2008 = vrcp.f32 %v494_v40 }
 0x52e   :  { %v2007_v44 = vpop.eup %2006 }
 0x52f   :  { %v2009_v46 = vpop.eup %2008  ;;  %v497_v47 = vmul.f32 %v2007_v44, %v477_v43 }
 0x530   :  { %v498_v48 = vmul.f32 %v2009_v46, %v478_v45 }
 0x531   :  { %v499_v49 = vsub.f32 %v2166_v63, %v497_v47 }
 0x532   :  { %v500_v50 = vsub.f32 %v2163_v62, %v498_v48 }
 0x533   :  { %v501_v52 = vsub.f32 %v499_v49, %v2108_v6 }
 0x534   :  { %v502_v53 = vsub.f32 %v500_v50, %v2106_v5 }
 0x535   :  { %v503_v55 = vmul.f32 %v501_v52, %v501_v52 }
 0x536   :  { %v504_v54 = vmul.f32 %v502_v53, %v502_v53 }
 0x538   :  { %505 = vmatprep.subr.mxu1 %v504_v54 }
 0x539   :  { %506 = vmatpush1.msra.mxu1 %v503_v55 }
 0x53a   :  { %1614 = vmatmul.mubr.msk.f32.vlgmr.msra.gmra.mrb[4].mxu1 %vm38_vm0, %v2157_v51 }
 0x53b   :  { %725 = vmatprep.mubr.f32.mxu1 %v2056_v4 }
 0x60d   :  { %v571_v56 = vpop.f32.mrb[4].mxu1 }
 0x60e   :  { %v573_v57 = vpop.f32.mrb[5].mxu1 }
 0x60f   :  { %v576_v58 = vadd.f32 %v573_v57, %v571_v56 }
 0x611   :  { %577 = vadd.xlane.f32.xlu0 %v576_v58 }
 0x69e   :  { %v578_v59 = vpop.xlane.xlu0 %577 }
 0x69f   :  { %v579_v60 = vadd.f32 1e-24, %v578_v59 }
 0x6a1   :  { %2010 = vrsqrt.f32 %v579_v60 }
 0x6ab   :  { %v2011_v61 = vpop.eup %2010 }
 0x6ac   :  { %v581_v62 = vmul.f32 0.0627451, %v2011_v61 }
 0x6ae   :  { %v582_v63 = vmin.f32 %v581_v62, 1.0 }
 0x6b0   :  { %v583_v0 = vmul.f32 %v582_v63, %v501_v52  ;;  %v584_v1 = vmul.f32 %v582_v63, %v502_v53 }
 0x6b2   :  { %v2208_v2 = vadd.f32 %v584_v1, %v2106_v5  ;;  %v2211_v3 = vadd.f32 %v583_v0, %v2108_v6 }
 0x6b4   :  { %590 = vmatprep.subr.mxu0 %v2208_v2 }
 0x6b5   :  { %591 = vmatpush1.msra.mxu0 %v2211_v3 }
 0x6b6   :  { %1617 = vmatmul.mubr.msk.f32.vlgmr.msra.gmra.mrb[6].mxu0 %vm38_vm0, %v2113_v7 }
 0x6b7   :  { %842 = vmatprep.mubr.f32.mxu0 %v2056_v4 }
 0x789   :  { %v656_v10 = vpop.f32.mrb[6].mxu0 }
 0x78a   :  { %v658_v11 = vpop.f32.mrb[7].mxu0  ;;  %v657_v13 = vadd.f32 %v1615_v9, %v656_v10 }
 0x78b   :  { %v659_v12 = vadd.f32 %v1616_v8, %v658_v11 }
 0x78d   :  { %661 = vmatprep.subr.mxu1 %v659_v12  ;;  %v1621_v12 = vld [vmem:[%s2691_s1 + $0x38] sm:$0xff] }
 0x78e   :  { %662 = vmatpush1.msra.mxu1 %v657_v13  ;;  %v1620_v13 = vld [vmem:[%s2691_s1 + $0x30] sm:$0xff] }
 0x78f   :  { %1618 = vmatmul.mubr.msk.f32.vlgmr.msra.gmra.mrb[6].mxu1 %vm38_vm0, %v2129_v14 }
 0x790   :  { %927 = vmatprep.mubr.f32.mxu1 %v2056_v4 }
 0x862   :  { %v727_v15 = vpop.f32.mrb[6].mxu1 }
 0x863   :  { %v734_v17 = vmul.f32 0.1, %v727_v15  ;;  %v742_v18 = vmul.f32 0.001, %v727_v15  ;;  %v729_v19 = vpop.f32.mrb[7].mxu1 }
 0x864   :  { %v735_v23 = vmul.f32 0.1, %v729_v19  ;;  %v743_v24 = vmul.f32 0.001, %v729_v19 }
 0x865   :  { %v736_v25 = vadd.f32 %v734_v17, %v732_v16  ;;  %v744_v27 = vmul.f32 %v742_v18, %v727_v15 }
 0x866   :  { %v737_v28 = vadd.f32 %v735_v23, %v733_v20  ;;  %v745_v32 = vmul.f32 %v743_v24, %v729_v19 }
 0x867   :  { %v746_v33 = vadd.f32 %v744_v27, %v740_v26  ;;  %v738_v45 = vmul.f32 3.690037, %v736_v25 }
 0x868   :  { %v747_v21 = vadd.f32 %v745_v32, %v741_v31  ;;  %v739_v46 = vmul.f32 3.690037, %v737_v28 }
 0x869   :  { %v2229_v22 = vmul.f32 333.6669, %v746_v33  ;;  %v750_v47 = vmul.f32 0.1, %v738_v45  ;;  %v1005_v19 = vmul.f32 0.9, %v738_v45 }
 0x86a   :  { %v2231_v34 = vmul.f32 333.6669, %v747_v21  ;;  %v751_v49 = vmul.f32 0.1, %v739_v46  ;;  %v1006_v24 = vmul.f32 0.9, %v739_v46 }
 0x86b   :  { %2012 = vrsqrt.f32 %v2229_v22  ;;  %vm754_vm9 = vcmp.eq.f32.partialorder %v2229_v22, inf  ;;  %v757_v29 = vand.u32 2147483648, %v2229_v22  ;;  %vm756_vm10 = vcmp.eq.f32.partialorder %v2229_v22, 0.0 }
 0x86c   :  { %2014 = vrsqrt.f32 %v2231_v34  ;;  %vm761_vm11 = vcmp.eq.f32.partialorder %v2231_v34, inf  ;;  %v764_v39 = vand.u32 2147483648, %v2231_v34  ;;  %vm763_vm12 = vcmp.eq.f32.partialorder %v2231_v34, 0.0 }
 0x86d   :  { %v1013_v28 = vmul.f32 0.999, %v2229_v22  ;;  %v1014_v33 = vmul.f32 0.999, %v2231_v34 }
 0x875   :  { %v2013_v35 = vpop.eup %2012 }
 0x876   :  { %v2015_v36 = vpop.eup %2014  ;;  %v753_v37 = vmul.f32 %v2013_v35, %v2229_v22 }
 0x877   :  { %v760_v30 = vmul.f32 %v2015_v36, %v2231_v34 }
 0x878   :  { %v755_v38 = vsel %vm754_vm9, %v2229_v22, %v753_v37 }
 0x879   :  { %v758_v40 = vsel %vm756_vm10, %v757_v29, %v755_v38  ;;  %v762_v41 = vsel %vm761_vm11, %v2231_v34, %v760_v30 }
 0x87a   :  { %v766_v42 = vadd.f32 1e-08, %v758_v40  ;;  %v765_v43 = vsel %vm763_vm12, %v764_v39, %v762_v41 }
 0x87b   :  { %v767_v44 = vadd.f32 1e-08, %v765_v43 }
 0x87c   :  { %2016 = vrcp.f32 %v766_v42 }
 0x87d   :  { %2018 = vrcp.f32 %v767_v44 }
 0x886   :  { %v2017_v48 = vpop.eup %2016 }
 0x887   :  { %v2019_v50 = vpop.eup %2018  ;;  %v770_v52 = vmul.f32 %v2017_v48, %v750_v47 }
 0x888   :  { %v771_v53 = vmul.f32 %v2019_v50, %v751_v49 }
 0x889   :  { %v772_v54 = vsub.f32 %v2211_v3, %v770_v52 }
 0x88a   :  { %v773_v55 = vsub.f32 %v2208_v2, %v771_v53 }
 0x88b   :  { %v774_v56 = vsub.f32 %v772_v54, %v2108_v6 }
 0x88c   :  { %v775_v57 = vsub.f32 %v773_v55, %v2106_v5 }
 0x88d   :  { %v776_v59 = vmul.f32 %v774_v56, %v774_v56 }
 0x88e   :  { %v777_v58 = vmul.f32 %v775_v57, %v775_v57 }
 0x890   :  { %778 = vmatprep.subr.mxu0 %v777_v58 }
 0x891   :  { %779 = vmatpush1.msra.mxu0 %v776_v59 }
 0x892   :  { %1619 = vmatmul.mubr.msk.f32.vlgmr.msra.gmra.mrb[8].mxu0 %vm38_vm0, %v2157_v51 }
 0x893   :  { %998 = vmatprep.mubr.f32.mxu0 %v2056_v4 }
 0x965   :  { %v844_v60 = vpop.f32.mrb[8].mxu0 }
 0x966   :  { %v846_v61 = vpop.f32.mrb[9].mxu0 }
 0x967   :  { %v849_v62 = vadd.f32 %v846_v61, %v844_v60 }
 0x969   :  { %850 = vadd.xlane.f32.xlu1 %v849_v62 }
 0x9f6   :  { %v851_v63 = vpop.xlane.xlu1 %850 }
 0x9f7   :  { %v852_v0 = vadd.f32 1e-24, %v851_v63 }
 0x9f9   :  { %2020 = vrsqrt.f32 %v852_v0  ;;  %v1161_v0 = vld [vmem:[%s2695_s5 + $0x80] sm:$0xff] }
 0xa03   :  { %v2021_v1 = vpop.eup %2020 }
 0xa04   :  { %v854_v2 = vmul.f32 0.0627451, %v2021_v1  ;;  %v1162_v1 = vld [vmem:[%s2695_s5 + $0x88] sm:$0xff] }
 0xa06   :  { %v855_v3 = vmin.f32 %v854_v2, 1.0  ;;  %v1894_v2 = vpack.c.bf16 %v1162_v1, %v1161_v0  ;;  %v1171_v0 = vld [vmem:[%s2695_s5 + $0xd0] sm:$0xff]  ;;  %v1172_v1 = vld [vmem:[%s2695_s5 + $0xd8] sm:$0xff] }
 0xa08   :  { %v856_v8 = vmul.f32 %v855_v3, %v774_v56  ;;  %v857_v9 = vmul.f32 %v855_v3, %v775_v57  ;;  %v1145_v3 = vld [vmem:[%s2695_s5] sm:$0xff] }
 0xa0a   :  { %v2253_v10 = vadd.f32 %v857_v9, %v2106_v5  ;;  %v2256_v11 = vadd.f32 %v856_v8, %v2108_v6  ;;  %v1641_v9 = vld [vmem:[%s2695_s5 + $0x180] sm:$0xff] }
 0xa0c   :  { %863 = vmatprep.subr.mxu1 %v2253_v10 }
 0xa0d   :  { %864 = vmatpush1.msra.mxu1 %v2256_v11 }
 0xa0e   :  { %1622 = vmatmul.mubr.msk.f32.vlgmr.msra.gmra.mrb[8].mxu1 %vm38_vm0, %v2113_v7 }
 0xa0f   :  { %1115 = vmatprep.mubr.f32.mxu1 %v2056_v4 }
 0xae1   :  { %v929_v15 = vpop.f32.mrb[8].mxu1 }
 0xae2   :  { %v931_v16 = vpop.f32.mrb[9].mxu1  ;;  %v930_v18 = vadd.f32 %v1620_v13, %v929_v15  ;;  %v1626_v13 = vld [vmem:[%s2695_s5 + $0x108] sm:$0xff] }
 0xae3   :  { %v932_v17 = vadd.f32 %v1621_v12, %v931_v16  ;;  %v1625_v12 = vld [vmem:[%s2695_s5 + $0x100] sm:$0xff]  ;;  %v1163_v16 = vld [vmem:[%s2695_s5 + $0x90] sm:$0xff] }
 0xae4   :  { %v1864_v15 = vpack.c.bf16 %v1626_v13, %v1625_v12  ;;  %v1635_v12 = vld [vmem:[%s2695_s5 + $0x150] sm:$0xff]  ;;  %v1636_v13 = vld [vmem:[%s2695_s5 + $0x158] sm:$0xff] }
 0xae5   :  { %934 = vmatprep.subr.mxu0 %v932_v17  ;;  %v1164_v17 = vld [vmem:[%s2695_s5 + $0x98] sm:$0xff] }
 0xae6   :  { %935 = vmatpush1.msra.mxu0 %v930_v18  ;;  %v1898_v18 = vpack.c.bf16 %v1164_v17, %v1163_v16  ;;  %v1173_v16 = vld [vmem:[%s2695_s5 + $0xe0] sm:$0xff]  ;;  %v1174_v17 = vld [vmem:[%s2695_s5 + $0xe8] sm:$0xff] }
 0xae7   :  { %1623 = vmatmul.mubr.msk.f32.vlgmr.msra.gmra.mrb[10].mxu0 %vm38_vm0, %v2129_v14 }
 0xbba   :  { %v1000_v7 = vpop.f32.mrb[10].mxu0 }
 0xbbb   :  { %v1007_v4 = vmul.f32 0.1, %v1000_v7  ;;  %v1015_v20 = vmul.f32 0.001, %v1000_v7  ;;  %v1002_v23 = vpop.f32.mrb[11].mxu0 }
 0xbbc   :  { %v1008_v25 = vmul.f32 0.1, %v1002_v23  ;;  %v1016_v26 = vmul.f32 0.001, %v1002_v23 }
 0xbbd   :  { %v1009_v27 = vadd.f32 %v1007_v4, %v1005_v19  ;;  %v1017_v31 = vmul.f32 %v1015_v20, %v1000_v7  ;;  %v1147_v7 = vld [vmem:[%s2695_s5 + $0x10] sm:$0xff]  ;;  %v1148_v19 = vld [vmem:[%s2695_s5 + $0x18] sm:$0xff] }
 0xbbe   :  { %v1010_v32 = vadd.f32 %v1008_v25, %v1006_v24  ;;  %v1018_v21 = vmul.f32 %v1016_v26, %v1002_v23  ;;  %v1900_v4 = vpack.c.bf16 %v1148_v19, %v1147_v7  ;;  %v1643_v20 = vld [vmem:[%s2695_s5 + $0x190] sm:$0xff]  ;;  %v1644_v23 = vld [vmem:[%s2695_s5 + $0x198] sm:$0xff]  ;;  %v1157_v7 = vld [vmem:[%s2695_s5 + $0x60] sm:$0xff] }
 0xbbf   :  { %v1019_v35 = vadd.f32 %v1017_v31, %v1013_v28  ;;  %v1011_v46 = vmul.f32 2.9078221, %v1009_v27  ;;  %v1866_v24 = vpack.c.bf16 %v1644_v23, %v1643_v20  ;;  %v1627_v25 = vld [vmem:[%s2695_s5 + $0x110] sm:$0xff]  ;;  %v1628_v26 = vld [vmem:[%s2695_s5 + $0x118] sm:$0xff]  ;;  %v1165_v28 = vld [vmem:[%s2695_s5 + $0xa0] sm:$0xff] }
 0xbc0   :  { %v1020_v36 = vadd.f32 %v1018_v21, %v1014_v33  ;;  %v1012_v47 = vmul.f32 2.9078221, %v1010_v32  ;;  %v1868_v27 = vpack.c.bf16 %v1628_v26, %v1627_v25  ;;  %v1166_v31 = vld [vmem:[%s2695_s5 + $0xa8] sm:$0xff]  ;;  %v1149_v33 = vld [vmem:[%s2695_s5 + $0x20] sm:$0xff] }
 0xbc1   :  { %v1021_v37 = vmul.f32 250.3753, %v1019_v35  ;;  %v1023_v48 = vmul.f32 0.1, %v1011_v46  ;;  %v1902_v32 = vpack.c.bf16 %v1166_v31, %v1165_v28  ;;  %v1150_v21 = vld [vmem:[%s2695_s5 + $0x28] sm:$0xff]  ;;  %v1631_v46 = vld [vmem:[%s2695_s5 + $0x130] sm:$0xff] }
 0xbc2   :  { %v1022_v14 = vmul.f32 250.3753, %v1020_v36  ;;  %v1024_v50 = vmul.f32 0.1, %v1012_v47  ;;  %v1904_v35 = vpack.c.bf16 %v1150_v21, %v1149_v33  ;;  %v1645_v36 = vld [vmem:[%s2695_s5 + $0x1a0] sm:$0xff]  ;;  %v1632_v47 = vld [vmem:[%s2695_s5 + $0x138] sm:$0xff] }
 0xbc3   :  { %2022 = vrsqrt.f32 %v1021_v37  ;;  %vm1027_vm13 = vcmp.eq.f32.partialorder %v1021_v37, inf  ;;  %v1030_v39 = vand.u32 2147483648, %v1021_v37  ;;  %vm1029_vm14 = vcmp.eq.f32.partialorder %v1021_v37, 0.0  ;;  %v1158_v19 = vld [vmem:[%s2695_s5 + $0x68] sm:$0xff]  ;;  %v1175_v28 = vld [vmem:[%s2695_s5 + $0xf0] sm:$0xff]  ;;  %v1176_v31 = vld [vmem:[%s2695_s5 + $0xf8] sm:$0xff] }
 0xbc4   :  { %2024 = vrsqrt.f32 %v1022_v14  ;;  %vm1034_vm15 = vcmp.eq.f32.partialorder %v1022_v14, inf  ;;  %v1037_v22 = vand.u32 2147483648, %v1022_v14  ;;  %vm1036_vm1 = vcmp.eq.f32.partialorder %v1022_v14, 0.0  ;;  %v1654_v23 = vld [vmem:[%s2695_s5 + $0x1e8] sm:$0xff]  ;;  %v1160_v21 = vld [vmem:[%s2695_s5 + $0x78] sm:$0xff] }
 0xbc5   :  { %v1920_v20 = vpack.c.bf16 %v1158_v19, %v1157_v7  ;;  %v1638_v25 = vld [vmem:[%s2695_s5 + $0x168] sm:$0xff]  ;;  %v1922_v33 = vpack.c.bf16 %v1176_v31, %v1175_v28  ;;  %v1677_v28 = vld [vmem:[%s2695_s5 + $0x2a0] sm:$0xff] }
 0xbc6   :  { %v1678_v31 = vld [vmem:[%s2695_s5 + $0x2a8] sm:$0xff] }
 0xbcd   :  { %v2023_v29 = vpop.eup %2022 }
 0xbce   :  { %v2025_v30 = vpop.eup %2024  ;;  %v1026_v38 = vmul.f32 %v2023_v29, %v1021_v37  ;;  %v1629_v29 = vld [vmem:[%s2695_s5 + $0x120] sm:$0xff] }
 0xbcf   :  { %v1033_v40 = vmul.f32 %v2025_v30, %v1022_v14  ;;  %v1630_v30 = vld [vmem:[%s2695_s5 + $0x128] sm:$0xff] }
 0xbd0   :  { %v1028_v41 = vsel %vm1027_vm13, %v1021_v37, %v1026_v38  ;;  %v1646_v37 = vld [vmem:[%s2695_s5 + $0x1a8] sm:$0xff]  ;;  %v1872_v38 = vpack.c.bf16 %v1630_v30, %v1629_v29  ;;  %v1639_v29 = vld [vmem:[%s2695_s5 + $0x170] sm:$0xff]  ;;  %v1640_v30 = vld [vmem:[%s2695_s5 + $0x178] sm:$0xff] }
 0xbd1   :  { %v1031_v42 = vsel %vm1029_vm14, %v1030_v39, %v1028_v41  ;;  %v1035_v43 = vsel %vm1034_vm15, %v1022_v14, %v1033_v40  ;;  %v1870_v14 = vpack.c.bf16 %v1646_v37, %v1645_v36  ;;  %v1167_v39 = vld [vmem:[%s2695_s5 + $0xb0] sm:$0xff]  ;;  %v1168_v40 = vld [vmem:[%s2695_s5 + $0xb8] sm:$0xff] }
 0xbd2   :  { %v1039_v34 = vadd.f32 1e-08, %v1031_v42  ;;  %v1038_v44 = vsel %vm1036_vm1, %v1037_v22, %v1035_v43  ;;  %v1906_v41 = vpack.c.bf16 %v1168_v40, %v1167_v39  ;;  %v1151_v22 = vld [vmem:[%s2695_s5 + $0x30] sm:$0xff]  ;;  %v1152_v42 = vld [vmem:[%s2695_s5 + $0x38] sm:$0xff]  ;;  %v1705_v39 = vld [vmem:[%s2695_s5 + $0x380] sm:$0xff] }
 0xbd3   :  { %v1040_v45 = vadd.f32 1e-08, %v1038_v44  ;;  %v1908_v43 = vpack.c.bf16 %v1152_v42, %v1151_v22  ;;  %v1648_v44 = vld [vmem:[%s2695_s5 + $0x1b8] sm:$0xff]  ;;  %v1706_v40 = vld [vmem:[%s2695_s5 + $0x388] sm:$0xff]  ;;  %v1673_v22 = vld [vmem:[%s2695_s5 + $0x280] sm:$0xff] }
 0xbd4   :  { %2026 = vrcp.f32 %v1039_v34  ;;  %v1647_v34 = vld [vmem:[%s2695_s5 + $0x1b0] sm:$0xff]  ;;  %v1656_v36 = vld [vmem:[%s2695_s5 + $0x1f8] sm:$0xff]  ;;  %v1674_v42 = vld [vmem:[%s2695_s5 + $0x288] sm:$0xff] }
 0xbd5   :  { %2028 = vrcp.f32 %v1040_v45  ;;  %v1874_v45 = vpack.c.bf16 %v1648_v44, %v1647_v34 }
 0xbde   :  { %v2027_v49 = vpop.eup %2026 }
 0xbdf   :  { %v2029_v52 = vpop.eup %2028  ;;  %v1043_v53 = vmul.f32 %v2027_v49, %v1023_v48  ;;  %v1876_v48 = vpack.c.bf16 %v1632_v47, %v1631_v46  ;;  %v1169_v49 = vld [vmem:[%s2695_s5 + $0xc0] sm:$0xff] }
 0xbe0   :  { %v1044_v54 = vmul.f32 %v2029_v52, %v1024_v50  ;;  %v1170_v50 = vld [vmem:[%s2695_s5 + $0xc8] sm:$0xff] }
 0xbe1   :  { %v1045_v55 = vsub.f32 %v2256_v11, %v1043_v53  ;;  %v1910_v52 = vpack.c.bf16 %v1170_v50, %v1169_v49  ;;  %v1153_v53 = vld [vmem:[%s2695_s5 + $0x40] sm:$0xff] }
 0xbe2   :  { %v1046_v56 = vsub.f32 %v2253_v10, %v1044_v54  ;;  %v1642_v10 = vld [vmem:[%s2695_s5 + $0x188] sm:$0xff] }
 0xbe3   :  { %v2276_v57 = vsub.f32 %v1045_v55, %v2108_v6  ;;  %v1862_v11 = vpack.c.bf16 %v1642_v10, %v1641_v9  ;;  %v1154_v54 = vld [vmem:[%s2695_s5 + $0x48] sm:$0xff]  ;;  %v1651_v9 = vld [vmem:[%s2695_s5 + $0x1d0] sm:$0xff]  ;;  %v1652_v10 = vld [vmem:[%s2695_s5 + $0x1d8] sm:$0xff] }
 0xbe4   :  { %v2279_v58 = vsub.f32 %v1046_v56, %v2106_v5  ;;  %v1912_v55 = vpack.c.bf16 %v1154_v54, %v1153_v53  ;;  %v1649_v56 = vld [vmem:[%s2695_s5 + $0x1c0] sm:$0xff] }
 0xbe5   :  { %v1049_v60 = vmul.f32 %v2276_v57, %v2276_v57  ;;  %1863 = vmatprep.subr.bf16.mxu0 %v1862_v11  ;;  %v1882_v11 = vpack.c.bf16 %v1652_v10, %v1651_v9  ;;  %v1709_v9 = vld [vmem:[%s2695_s5 + $0x3a0] sm:$0xff] }
 0xbe6   :  { %v1050_v59 = vmul.f32 %v2279_v58, %v2279_v58  ;;  %1865 = vmatpush3.bf16.msra.mxu0 %v1864_v15  ;;  %v1884_v15 = vpack.c.bf16 %v1636_v13, %v1635_v12 }
 0xbe7   :  { %1867 = vmatprep.subr.bf16.mxu0 %v1866_v24  ;;  %v1637_v24 = vld [vmem:[%s2695_s5 + $0x160] sm:$0xff] }
 0xbe8   :  { %1051 = vmatprep.subr.mxu1 %v1050_v59  ;;  %v1650_v59 = vld [vmem:[%s2695_s5 + $0x1c8] sm:$0xff] }
 0xbe9   :  { %1052 = vmatpush1.msra.mxu1 %v1049_v60  ;;  %v1878_v60 = vpack.c.bf16 %v1650_v59, %v1649_v56 }
 0xbea   :  { %1624 = vmatmul.mubr.msk.f32.vlgmr.msra.gmra.mrb[10].mxu1 %vm38_vm0, %v2157_v51  ;;  %v1146_v51 = vld [vmem:[%s2695_s5 + $0x8] sm:$0xff]  ;;  %1895 = vmatprep.subr.bf16.mxu1 %v1894_v2  ;;  %v1914_v2 = vpack.c.bf16 %v1172_v1, %v1171_v0  ;;  %v1708_v0 = vld [vmem:[%s2695_s5 + $0x398] sm:$0xff]  ;;  %v1691_v1 = vld [vmem:[%s2695_s5 + $0x310] sm:$0xff] }
 0xbeb   :  { %v1896_v8 = vpack.c.bf16 %v1146_v51, %v1145_v3  ;;  %1869 = vmatpush3.bf16.msra.mxu0 %v1868_v27  ;;  %v1155_v3 = vld [vmem:[%s2695_s5 + $0x50] sm:$0xff]  ;;  %v1156_v51 = vld [vmem:[%s2695_s5 + $0x58] sm:$0xff]  ;;  %v1888_v27 = vpack.c.bf16 %v1638_v25, %v1637_v24 }
 0xbec   :  { %1871 = vmatprep.subr.bf16.mxu0 %v1870_v14  ;;  %v1659_v24 = vld [vmem:[%s2695_s5 + $0x210] sm:$0xff]  ;;  %v1660_v25 = vld [vmem:[%s2695_s5 + $0x218] sm:$0xff] }
 0xbed   :  { %1897 = vmatpush3.bf16.msra.mxu1 %v1896_v8  ;;  %v1916_v8 = vpack.c.bf16 %v1156_v51, %v1155_v3  ;;  %v1675_v51 = vld [vmem:[%s2695_s5 + $0x290] sm:$0xff] }
 0xbee   :  { %1899 = vmatprep.subr.bf16.mxu1 %v1898_v18  ;;  %v1918_v18 = vpack.c.bf16 %v1174_v17, %v1173_v16 }
 0xbef   :  { %1873 = vmatpush3.bf16.msra.mxu0 %v1872_v38  ;;  %v1892_v38 = vpack.c.bf16 %v1640_v30, %v1639_v29  ;;  %v1661_v29 = vld [vmem:[%s2695_s5 + $0x220] sm:$0xff]  ;;  %v1662_v30 = vld [vmem:[%s2695_s5 + $0x228] sm:$0xff] }
 0xbf0   :  { %1875 = vmatprep.subr.bf16.mxu0 %v1874_v45 }
 0xbf1   :  { %1901 = vmatpush3.bf16.msra.mxu1 %v1900_v4  ;;  %v1653_v4 = vld [vmem:[%s2695_s5 + $0x1e0] sm:$0xff] }
 0xbf2   :  { %1903 = vmatprep.subr.bf16.mxu1 %v1902_v32  ;;  %v1886_v26 = vpack.c.bf16 %v1654_v23, %v1653_v4  ;;  %v1159_v32 = vld [vmem:[%s2695_s5 + $0x70] sm:$0xff] }
 0xbf3   :  { %1877 = vmatpush3.bf16.msra.mxu0 %v1876_v48  ;;  %v1924_v37 = vpack.c.bf16 %v1160_v21, %v1159_v32  ;;  %v1694_v21 = vld [vmem:[%s2695_s5 + $0x328] sm:$0xff] }
 0xbf4   :  { %1879 = vmatprep.subr.bf16.mxu0 %v1878_v60 }
 0xbf5   :  { %1905 = vmatpush3.bf16.msra.mxu1 %v1904_v35  ;;  %v1655_v35 = vld [vmem:[%s2695_s5 + $0x1f0] sm:$0xff] }
 0xbf6   :  { %1907 = vmatprep.subr.bf16.mxu1 %v1906_v41  ;;  %v1890_v14 = vpack.c.bf16 %v1656_v36, %v1655_v35  ;;  %v1958_v41 = vpack.c.bf16 %v1706_v40, %v1705_v39  ;;  %v1932_v35 = vpack.c.bf16 %v1660_v25, %v1659_v24  ;;  %v1711_v36 = vld [vmem:[%s2695_s5 + $0x3b0] sm:$0xff]  ;;  %v1680_v40 = vld [vmem:[%s2695_s5 + $0x2b8] sm:$0xff] }
 0xbf7   :  { %v1679_v39 = vld [vmem:[%s2695_s5 + $0x2b0] sm:$0xff]  ;;  %v1688_v25 = vld [vmem:[%s2695_s5 + $0x2f8] sm:$0xff] }
 0xbf8   :  { %v1687_v24 = vld [vmem:[%s2695_s5 + $0x2f0] sm:$0xff] }
 0xbf9   :  { %1909 = vmatpush3.bf16.msra.mxu1 %v1908_v43  ;;  %v1926_v43 = vpack.c.bf16 %v1674_v42, %v1673_v22  ;;  %v1695_v22 = vld [vmem:[%s2695_s5 + $0x330] sm:$0xff]  ;;  %v1696_v42 = vld [vmem:[%s2695_s5 + $0x338] sm:$0xff] }
 0xbfa   :  { %1911 = vmatprep.subr.bf16.mxu1 %v1910_v52 }
 0xbfd   :  { %1913 = vmatpush3.bf16.msra.mxu1 %v1912_v55 }
 0xbfe   :  { %1915 = vmatprep.subr.bf16.mxu1 %v1914_v2  ;;  %v1692_v2 = vld [vmem:[%s2695_s5 + $0x318] sm:$0xff] }
 0xc01   :  { %1917 = vmatpush3.bf16.msra.mxu1 %v1916_v8  ;;  %v1676_v8 = vld [vmem:[%s2695_s5 + $0x298] sm:$0xff] }
 0xc02   :  { %1919 = vmatprep.subr.bf16.mxu1 %v1918_v18  ;;  %v1710_v18 = vld [vmem:[%s2695_s5 + $0x3a8] sm:$0xff]  ;;  %v1930_v23 = vpack.c.bf16 %v1676_v8, %v1675_v51  ;;  %v1667_v8 = vld [vmem:[%s2695_s5 + $0x250] sm:$0xff] }
 0xc03   :  { %v1966_v32 = vpack.c.bf16 %v1710_v18, %v1709_v9  ;;  %v1668_v9 = vld [vmem:[%s2695_s5 + $0x258] sm:$0xff]  ;;  %v1719_v18 = vld [vmem:[%s2695_s5 + $0x3f0] sm:$0xff] }
 0xc05   :  { %1921 = vmatpush3.bf16.msra.mxu1 %v1920_v20 }
 0xc06   :  { %1923 = vmatprep.subr.bf16.mxu1 %v1922_v33  ;;  %v1693_v33 = vld [vmem:[%s2695_s5 + $0x320] sm:$0xff] }
 0xc09   :  { %1925 = vmatpush3.bf16.msra.mxu1 %v1924_v37  ;;  %v1712_v37 = vld [vmem:[%s2695_s5 + $0x3b8] sm:$0xff] }
 0xc0a   :  { %1959 = vmatprep.subr.bf16.mxu1 %v1958_v41  ;;  %v1970_v41 = vpack.c.bf16 %v1712_v37, %v1711_v36 }
 0xcbd   :  { %v1117_v61 = vpop.f32.mrb[10].mxu1 }
 0xcbe   :  { %v1119_v62 = vpop.f32.mrb[11].mxu1 }
 0xcbf   :  { %v1122_v63 = vadd.f32 %v1119_v62, %v1117_v61  ;;  %v1633_v61 = vld [vmem:[%s2695_s5 + $0x140] sm:$0xff]  ;;  %v1634_v62 = vld [vmem:[%s2695_s5 + $0x148] sm:$0xff] }
 0xcc1   :  { %1123 = vadd.xlane.f32.xlu1 %v1122_v63  ;;  %v1880_v63 = vpack.c.bf16 %v1634_v62, %v1633_v61 }
 0xcc3   :  { %1881 = vmatpush3.bf16.msra.mxu0 %v1880_v63  ;;  %v1707_v63 = vld [vmem:[%s2695_s5 + $0x390] sm:$0xff] }
 0xcc4   :  { %1883 = vmatprep.subr.bf16.mxu0 %v1882_v11  ;;  %v1962_v20 = vpack.c.bf16 %v1708_v0, %v1707_v63  ;;  %v1699_v63 = vld [vmem:[%s2695_s5 + $0x350] sm:$0xff]  ;;  %v1700_v0 = vld [vmem:[%s2695_s5 + $0x358] sm:$0xff] }
 0xcc7   :  { %1885 = vmatpush3.bf16.msra.mxu0 %v1884_v15 }
 0xcc8   :  { %1887 = vmatprep.subr.bf16.mxu0 %v1886_v26 }
 0xccb   :  { %1889 = vmatpush3.bf16.msra.mxu0 %v1888_v27  ;;  %v1964_v27 = vpack.c.bf16 %v1692_v2, %v1691_v1  ;;  %v1717_v2 = vld [vmem:[%s2695_s5 + $0x3e0] sm:$0xff] }
 0xccc   :  { %1891 = vmatprep.subr.bf16.mxu0 %v1890_v14  ;;  %v1934_v14 = vpack.c.bf16 %v1678_v31, %v1677_v28  ;;  %v1704_v28 = vld [vmem:[%s2695_s5 + $0x378] sm:$0xff] }
 0xccf   :  { %1893 = vmatpush3.bf16.msra.mxu0 %v1892_v38  ;;  %v1968_v38 = vpack.c.bf16 %v1694_v21, %v1693_v33  ;;  %v1671_v33 = vld [vmem:[%s2695_s5 + $0x270] sm:$0xff]  ;;  %v1672_v21 = vld [vmem:[%s2695_s5 + $0x278] sm:$0xff] }
 0xcd0   :  { %1927 = vmatprep.subr.bf16.mxu0 %v1926_v43  ;;  %v1936_v43 = vpack.c.bf16 %v1662_v30, %v1661_v29  ;;  %v1956_v36 = vpack.c.bf16 %v1672_v21, %v1671_v33 }
 0xd4e   :  { %v1124_v34 = vpop.xlane.xlu1 %1123 }
 0xd4f   :  { %v1125_v44 = vadd.f32 1e-24, %v1124_v34  ;;  %v1713_v34 = vld [vmem:[%s2695_s5 + $0x3c0] sm:$0xff] }
 0xd51   :  { %2030 = vrsqrt.f32 %v1125_v44  ;;  %v1714_v44 = vld [vmem:[%s2695_s5 + $0x3c8] sm:$0xff] }
 0xd5b   :  { %v2031_v45 = vpop.eup %2030 }
 0xd5c   :  { %v1127_v46 = vmul.f32 0.0627451, %v2031_v45  ;;  %v1938_v45 = vpack.c.bf16 %v1680_v40, %v1679_v39 }
 0xd5e   :  { %v1128_v47 = vmin.f32 %v1127_v46, 1.0  ;;  %v1663_v46 = vld [vmem:[%s2695_s5 + $0x230] sm:$0xff] }
 0xd60   :  { %v1129_v48 = vmul.f32 %v1128_v47, %v2276_v57  ;;  %v1130_v49 = vmul.f32 %v1128_v47, %v2279_v58  ;;  %v1689_v57 = vld [vmem:[%s2695_s5 + $0x300] sm:$0xff]  ;;  %v1658_v58 = vld [vmem:[%s2695_s5 + $0x208] sm:$0xff]  ;;  %v1664_v47 = vld [vmem:[%s2695_s5 + $0x238] sm:$0xff] }
 0xd62   :  { %v1131_v50 = vadd.f32 %v1129_v48, %v2108_v6  ;;  %v1132_v52 = vadd.f32 %v1130_v49, %v2106_v5  ;;  %v1690_v6 = vld [vmem:[%s2695_s5 + $0x308] sm:$0xff]  ;;  %v1657_v5 = vld [vmem:[%s2695_s5 + $0x200] sm:$0xff]  ;;  %v1972_v48 = vpack.c.bf16 %v1696_v42, %v1695_v22 }
 0xd63   :  { %v1960_v3 = vpack.c.bf16 %v1690_v6, %v1689_v57  ;;  %v1928_v17 = vpack.c.bf16 %v1658_v58, %v1657_v5  ;;  %v1681_v49 = vld [vmem:[%s2695_s5 + $0x2c0] sm:$0xff]  ;;  %v1683_v6 = vld [vmem:[%s2695_s5 + $0x2d0] sm:$0xff]  ;;  %v1684_v5 = vld [vmem:[%s2695_s5 + $0x2d8] sm:$0xff] }
 0xd64   :  { %v1133_v53 = vmul.f32 0.5, %v1131_v50  ;;  %v1134_v54 = vmul.f32 0.5, %v1132_v52  ;;  %v1682_v50 = vld [vmem:[%s2695_s5 + $0x2c8] sm:$0xff]  ;;  %v1974_v52 = vpack.c.bf16 %v1714_v44, %v1713_v34  ;;  %v1946_v51 = vpack.c.bf16 %v1684_v5, %v1683_v6 }
 0xd66   :  { %v1135_v55 = vadd.f32 0.5, %v1133_v53  ;;  %v1136_v56 = vadd.f32 0.5, %v1134_v54  ;;  %v1697_v53 = vld [vmem:[%s2695_s5 + $0x340] sm:$0xff]  ;;  %v1698_v54 = vld [vmem:[%s2695_s5 + $0x348] sm:$0xff] }
 0xd67   :  { %v1976_v57 = vpack.c.bf16 %v1698_v54, %v1697_v53 }
 0xd68   :  { %v1137_v59 = vmax.f32 %v1135_v55, 0.0  ;;  %v1138_v60 = vmax.f32 %v1136_v56, 0.0  ;;  %v1940_v55 = vpack.c.bf16 %v1664_v47, %v1663_v46  ;;  %v1715_v56 = vld [vmem:[%s2695_s5 + $0x3d0] sm:$0xff] }
 0xd6a   :  { %v1139_v61 = vmin.f32 %v1137_v59, 1.0  ;;  %v1140_v62 = vmin.f32 %v1138_v60, 1.0  ;;  %v1716_v59 = vld [vmem:[%s2695_s5 + $0x3d8] sm:$0xff]  ;;  %v1942_v60 = vpack.c.bf16 %v1682_v50, %v1681_v49  ;;  %v1721_v50 = vld [vmem:[%s2696_s6] ss:$0 sm:$0xff] }
 0xd6b   :  { %v1978_v58 = vpack.c.bf16 %v1716_v59, %v1715_v56 }
 0xd6c   :  { %1141 = vst [vmem:[#allocation2] sm:$0xff] %v1139_v61  ;;  %1142 = vst [vmem:[#allocation2 + $0x8] sm:$0xff] %v1140_v62  ;;  %v1665_v61 = vld [vmem:[%s2695_s5 + $0x240] sm:$0xff]  ;;  %v1666_v62 = vld [vmem:[%s2695_s5 + $0x248] sm:$0xff] }
 0xd6d   :  { %v1944_v1 = vpack.c.bf16 %v1666_v62, %v1665_v61 }
 0xd73   :  { %v1144_v10 = vld [vmem:[#allocation2 + $0x8] sm:$0x3]  ;;  %v1143_v11 = vld [vmem:[#allocation2] sm:$0x3]  ;;  %v1178_v12 = vld [vmem:[#allocation2 + $0x8] sm:$0xc] }
 0xd74   :  { %1352 = vmatprep.mubr.f32.mxu1 %v1144_v10  ;;  %v1215_v13 = vrot.slane %v1178_v12, 2  ;;  %v1471_v15 = vld [vmem:[#allocation2 + $0x8] sm:$0xc0]  ;;  %v1177_v16 = vld [vmem:[#allocation2] sm:$0xc]  ;;  %v1980_v10 = vpack.c.bf16 %v1700_v0, %v1699_v63 }
 0xd75   :  { %1353 = vmatmul.mubr.f32.vlgmr.msra.gmra.mrb[12].mxu1 %v1143_v11  ;;  %v1508_v7 = vrot.slane %v1471_v15, 6  ;;  %v1214_v19 = vrot.slane %v1177_v16, 2  ;;  %v1359_v4 = vld [vmem:[#allocation2 + $0x8] sm:$0x30]  ;;  %v1685_v11 = vld [vmem:[%s2695_s5 + $0x2e0] sm:$0xff] }
 0xd76   :  { %1961 = vmatpush3.bf16.msra.mxu1 %v1960_v3  ;;  %1282 = vmatprep.mubr.f32.mxu0 %v1215_v13  ;;  %v1396_v26 = vrot.slane %v1359_v4, 4  ;;  %v1718_v3 = vld [vmem:[%s2695_s5 + $0x3e8] sm:$0xff]  ;;  %v1701_v15 = vld [vmem:[%s2695_s5 + $0x360] sm:$0xff] }
 0xd77   :  { %1575 = vmatprep.mubr.f32.mxu1 %v1508_v7  ;;  %1283 = vmatmul.mubr.f32.vlgmr.msra.gmra.mrb[12].mxu0 %v1214_v19  ;;  %v1686_v12 = vld [vmem:[%s2695_s5 + $0x2e8] sm:$0xff]  ;;  %v1982_v13 = vpack.c.bf16 %v1718_v3, %v1717_v2  ;;  %v1720_v7 = vld [vmem:[%s2695_s5 + $0x3f8] sm:$0xff]  ;;  %v1669_v4 = vld [vmem:[%s2695_s5 + $0x260] sm:$0xff] }
 0xd78   :  { %1929 = vmatpush3.bf16.msra.mxu0 %v1928_v17  ;;  %1463 = vmatprep.mubr.f32.mxu0 %v1396_v26  ;;  %v1702_v16 = vld [vmem:[%s2695_s5 + $0x368] sm:$0xff]  ;;  %v1948_v17 = vpack.c.bf16 %v1668_v9, %v1667_v8  ;;  %v1950_v19 = vpack.c.bf16 %v1686_v12, %v1685_v11  ;;  %v1986_v26 = vpack.c.bf16 %v1720_v7, %v1719_v18  ;;  %v1470_v37 = vld [vmem:[#allocation2] sm:$0xc0] }
 0xd79   :  { %1963 = vmatprep.subr.bf16.mxu1 %v1962_v20  ;;  %1931 = vmatprep.subr.bf16.mxu0 %v1930_v23  ;;  %v1670_v20 = vld [vmem:[%s2695_s5 + $0x268] sm:$0xff]  ;;  %v1984_v23 = vpack.c.bf16 %v1702_v16, %v1701_v15  ;;  %v1507_v29 = vrot.slane %v1470_v37, 6 }
 0xd7a   :  { %1965 = vmatpush3.bf16.msra.mxu1 %v1964_v27  ;;  %v1703_v27 = vld [vmem:[%s2695_s5 + $0x370] sm:$0xff]  ;;  %v1952_v31 = vpack.c.bf16 %v1670_v20, %v1669_v4 }
 0xd7b   :  { %1967 = vmatprep.subr.bf16.mxu1 %v1966_v32  ;;  %v1954_v32 = vpack.c.bf16 %v1688_v25, %v1687_v24 }
 0xd7c   :  { %1933 = vmatpush3.bf16.msra.mxu0 %v1932_v35  ;;  %v1988_v35 = vpack.c.bf16 %v1704_v28, %v1703_v27 }
 0xd7d   :  { %1935 = vmatprep.subr.bf16.mxu0 %v1934_v14  ;;  %v1358_v14 = vld [vmem:[#allocation2] sm:$0x30] }
 0xd7e   :  { %1969 = vmatpush3.bf16.msra.mxu1 %v1968_v38  ;;  %v1395_v30 = vrot.slane %v1358_v14, 4 }
 0xd7f   :  { %1971 = vmatprep.subr.bf16.mxu1 %v1970_v41 }
 0xd80   :  { %1937 = vmatpush3.bf16.msra.mxu0 %v1936_v43 }
 0xd81   :  { %1939 = vmatprep.subr.bf16.mxu0 %v1938_v45 }
 0xd82   :  { %1973 = vmatpush3.bf16.msra.mxu1 %v1972_v48 }
 0xd83   :  { %1975 = vmatprep.subr.bf16.mxu1 %v1974_v52 }
 0xd84   :  { %1941 = vmatpush3.bf16.msra.mxu0 %v1940_v55 }
 0xd85   :  { %1943 = vmatprep.subr.bf16.mxu0 %v1942_v60 }
 0xd86   :  { %1977 = vmatpush3.bf16.msra.mxu1 %v1976_v57 }
 0xd87   :  { %1979 = vmatprep.subr.bf16.mxu1 %v1978_v58 }
 0xd88   :  { %1945 = vmatpush3.bf16.msra.mxu0 %v1944_v1 }
 0xd89   :  { %1947 = vmatprep.subr.bf16.mxu0 %v1946_v51 }
 0xd8a   :  { %1981 = vmatpush3.bf16.msra.mxu1 %v1980_v10 }
 0xd8b   :  { %1983 = vmatprep.subr.bf16.mxu1 %v1982_v13 }
 0xd8c   :  { %1949 = vmatpush3.bf16.msra.mxu0 %v1948_v17 }
 0xd8d   :  { %1951 = vmatprep.subr.bf16.mxu0 %v1950_v19 }
 0xd8e   :  { %1985 = vmatpush3.bf16.msra.mxu1 %v1984_v23 }
 0xd8f   :  { %1987 = vmatprep.subr.bf16.mxu1 %v1986_v26 }
 0xd90   :  { %1953 = vmatpush3.bf16.msra.mxu0 %v1952_v31 }
 0xd91   :  { %1955 = vmatprep.subr.bf16.mxu0 %v1954_v32 }
 0xd92   :  { %1989 = vmatpush3.bf16.msra.mxu1 %v1988_v35 }
 0xd94   :  { %1957 = vmatpush3.bf16.msra.mxu0 %v1956_v36 }
 0xd95   :  { %1576 = vmatmul.mubr.f32.vlgmr.msra.gmra.mrb[14].mxu1 %v1507_v29 }
 0xd97   :  { %1464 = vmatmul.mubr.f32.vlgmr.msra.gmra.mrb[14].mxu0 %v1395_v30 }
 0xe48   :  { %v1789_v38 = vpop.f32.mrb[12].mxu1 }
 0xe49   :  { %v1790_v39 = vpop.f32.mrb[13].mxu1 }
 0xe4a   :  { %v1791_v40 = vadd.f32 %v1790_v39, %v1789_v38  ;;  %v1754_v41 = vpop.f32.mrb[12].mxu0 }
 0xe4b   :  { %v1755_v22 = vpop.f32.mrb[13].mxu0 }
 0xe4c   :  { %v1756_v42 = vadd.f32 %v1755_v22, %v1754_v41 }
 0xe4e   :  { %v1355_v43 = vadd.f32 %v1791_v40, %v1756_v42 }
 0xe68   :  { %v1859_v34 = vpop.f32.mrb[14].mxu1 }
 0xe69   :  { %v1860_v44 = vpop.f32.mrb[15].mxu1 }
 0xe6a   :  { %v1861_v45 = vadd.f32 %v1860_v44, %v1859_v34  ;;  %v1824_v46 = vpop.f32.mrb[14].mxu0 }
 0xe6b   :  { %v1825_v47 = vpop.f32.mrb[15].mxu0 }
 0xe6c   :  { %v1826_v48 = vadd.f32 %v1825_v47, %v1824_v46 }
 0xe6e   :  { %v1469_v49 = vadd.f32 %v1826_v48, %v1355_v43 }
 0xe70   :  { %v1581_v52 = vadd.f32 %v1861_v45, %v1469_v49 }
 0xe72   :  { %v1589_v53 = vadd.f32 %v1721_v50, %v1581_v52 }
 0xe74   :  { %1590 = vst [vmem:[#allocation3] sm:$0x3] %v1589_v53 }
 0xe75   :  { %2043 = shalt.err (!%p2040_p4)
}
 0xe76   :  { %s2044_s8 = scalar_lea.hbm %s2697_s7, 32 }
 0xe77   :  { %p2045_p5 = scmp.ne.s32.totalorder %s2697_s7, %s2044_s8  ;;  %p2048_p6 = scmp.lt.u32.totalorder %s2044_s8, %s2697_s7 }
 0xe79   :  { %p2050_p7 = pnand %p2048_p6, %p2045_p5 }
 0xe7b   :  { %2053 = shalt.err (!%p2050_p7)
}
 0xe7c   :  { %1600 = dma.vmem_to_hbm [thread:$0]  %s1598_s28, 32, %s2697_s7, [#allocation4]  }
 0xe7d   :  { %2054 = dma.done.wait [#allocation4], 32  }
 0xe7e   :  { %2055 = vsyncadd [#allocation4], 4294967264 }
 0xe7f   :  { %1604 = vsyncpa [#allocation4], 1 }

</bundles_post_ra>
